<compile_context>
chip_gen: v7x
topology: tpu7x:2x2x1
jax: 0.10.0
libtpu: 0.0.40
codegen_flags: <defaults>
</compile_context>

<pallas_src>
import functools

import jax
import jax.numpy as jnp
from jax import lax
from jax.experimental import pallas as pl
from jax.experimental.pallas import tpu as pltpu

_LANE = 128
_NEG = -1e30  # bias for padded tag columns -> exp() == 0 under the softmax


def _round_up(x, m):
    return -(-x // m) * m


def _lstm_gen_kernel(ids_ref, emb_ref, wih_ref, whh_ref, b_ref, wgen_ref,
                     bgen_ref, gumbel_ref, out_ref, xw, h_all, *,
                     hidden_pad, tau):
    seq_len = out_ref.shape[0]
    Hp = hidden_pad
    vocab_p = emb_ref.shape[0]

    # ---- embedding gather as a single one-hot MXU matmul --------------------
    ids = ids_ref[...]                                             # (seq, 1) i32
    iota = lax.broadcasted_iota(jnp.int32, (seq_len, vocab_p), 1)  # (seq, Vp)
    onehot = (iota == ids).astype(jnp.float32)                     # (seq, Vp)
    emb_x = jnp.dot(onehot, emb_ref[...],
                    preferred_element_type=jnp.float32)            # (seq, Ep)

    # ---- hoisted input projection: one batched MXU matmul -------------------
    xw[...] = (jnp.dot(emb_x, wih_ref[...],
                       preferred_element_type=jnp.float32) + b_ref[...])

    # ---- LSTM recurrence: only h @ W_hh is serial ----------------------------
    def step(t, carry):
        h, c = carry
        gates = xw[pl.ds(t, 1), :] + jnp.dot(
            h, whh_ref[...], preferred_element_type=jnp.float32)   # (1, 4Hp)
        # PyTorch gate order i, f, g, o; every gate slice is 128-lane aligned.
        # One fused sigmoid over all gates; g-gate pre-activation is pre-doubled
        # in pack_params so tanh(x) = 2*sigmoid(2x) - 1 is a cheap VPU fma.
        sig = jax.nn.sigmoid(gates)
        i_g = sig[:, 0:Hp]
        f_g = sig[:, Hp:2 * Hp]
        g_g = 2.0 * sig[:, 2 * Hp:3 * Hp] - 1.0
        o_g = sig[:, 3 * Hp:4 * Hp]
        c_new = f_g * c + i_g * g_g
        h_new = o_g * jnp.tanh(c_new)
        h_all[pl.ds(t, 1), :] = h_new
        return (h_new, c_new)

    zeros = jnp.zeros((1, Hp), jnp.float32)
    lax.fori_loop(0, seq_len, step, (zeros, zeros),
                  unroll=min(int(seq_len), 8))

    # ---- output projection + soft gumbel-softmax ----------------------------
    logits = (jnp.dot(h_all[...], wgen_ref[...],
                      preferred_element_type=jnp.float32) + bgen_ref[...])
    z = (logits + gumbel_ref[...]) * (1.0 / tau)
    z = z - jnp.max(z, axis=-1, keepdims=True)
    e = jnp.exp(z)
    denom = jnp.sum(e, axis=-1, keepdims=True)       # >= 1 (max-subtracted)
    inv = pl.reciprocal(denom, approx=True)          # EUP slot (otherwise idle)
    inv = inv * (2.0 - denom * inv)                  # one Newton step -> f32 acc.
    out_ref[...] = e * inv


def generative_model_rnn_forward(sentence, params, gumbel_noise, *, tau=0.5):
    """sentence: (seq,) int32 token ids. Returns (seq, tagset) f32 soft scores."""
    emb_table = params["embedding"]          # (Vp, Ep)
    wih = params["w_ih_t"]                   # (Ep, 4Hp)
    whh = params["w_hh_t"]                   # (Hp, 4Hp)
    b = params["b"]                          # (1, 4Hp)
    wgen = params["w_gen_t"]                 # (Hp, Tp)
    bgen = params["b_gen"]                   # (1, Tp)
    T = params["tagset_size"]

    seq_len = sentence.shape[0]
    Vp, Ep = emb_table.shape
    Hp = whh.shape[0]
    Tp = wgen.shape[1]

    ids2d = sentence.astype(jnp.int32).reshape(seq_len, 1)
    gumbel_p = jnp.pad(gumbel_noise.astype(jnp.float32), ((0, 0), (0, Tp - T)))

    kernel = functools.partial(_lstm_gen_kernel, hidden_pad=Hp, tau=tau)
    full = lambda shape: pl.BlockSpec(shape, lambda i: (0, 0))

    # Explicit VMEM budget: in/out buffers (x2 for Pallas buffering) + scratch
    # + headroom, floored at 16 MiB and capped well below v7x's 64 MiB physical.
    f32 = 4
    io_elems = (seq_len * 1 + Vp * Ep + Ep * 4 * Hp + Hp * 4 * Hp + 4 * Hp
                + Hp * Tp + Tp + 2 * seq_len * Tp)
    scratch_elems = seq_len * 4 * Hp + seq_len * Hp
    vmem_limit = int(min(48 << 20,
                         max(16 << 20,
                             2 * io_elems * f32 + scratch_elems * f32 + (4 << 20))))

    out = pl.pallas_call(
        kernel,
        out_shape=jax.ShapeDtypeStruct((seq_len, Tp), jnp.float32),
        grid_spec=pltpu.PrefetchScalarGridSpec(
            num_scalar_prefetch=0,
            grid=(1,),
            in_specs=[
                full((seq_len, 1)),      # token ids
                full((Vp, Ep)),          # embedding table (small vocab -> VMEM)
                full((Ep, 4 * Hp)),
                full((Hp, 4 * Hp)),
                full((1, 4 * Hp)),
                full((Hp, Tp)),
                full((1, Tp)),
                full((seq_len, Tp)),     # gumbel noise
            ],
            out_specs=full((seq_len, Tp)),
            scratch_shapes=[
                pltpu.VMEM((seq_len, 4 * Hp), jnp.float32),   # hoisted x@W_ih + b
                pltpu.VMEM((seq_len, Hp), jnp.float32),       # all hidden states
            ],
        ),
        compiler_params=pltpu.CompilerParams(
            dimension_semantics=("arbitrary",),
            vmem_limit_bytes=vmem_limit),
    )(ids2d, emb_table, wih, whh, b, wgen, bgen, gumbel_p)
    return out[:, :T]


def init_params(key, vocab_size, embedding_dim, hidden_dim, tagset_size):
    """Raw parameters in PyTorch layout (Embedding / LSTM / Linear)."""
    ks = jax.random.split(key, 7)
    s = 0.1
    return {
        "embedding": jax.random.normal(ks[0], (vocab_size, embedding_dim), jnp.float32),
        "w_ih": s * jax.random.normal(ks[1], (4 * hidden_dim, embedding_dim), jnp.float32),
        "w_hh": s * jax.random.normal(ks[2], (4 * hidden_dim, hidden_dim), jnp.float32),
        "b_ih": s * jax.random.normal(ks[3], (4 * hidden_dim,), jnp.float32),
        "b_hh": s * jax.random.normal(ks[4], (4 * hidden_dim,), jnp.float32),
        "w_gen": s * jax.random.normal(ks[5], (tagset_size, hidden_dim), jnp.float32),
        "b_gen": s * jax.random.normal(ks[6], (tagset_size,), jnp.float32),
    }


def pack_params(raw):
    """Pad V, E, H, T to lane width (128) and transpose to kernel layouts.

    Zero-padded gate blocks keep padded hidden lanes exactly zero through the
    recurrence (f=i=o=0.5, g=0 on a zero state stays zero), so valid lanes are
    identical to the unpadded math. Padded tag columns get a -1e30 bias so
    they vanish under the softmax. The g-gate columns of W_ih/W_hh/b are
    pre-multiplied by 2 so the kernel computes tanh via 2*sigmoid(2x)-1 in one
    fused sigmoid pass.
    """
    V, E = raw["embedding"].shape
    H = raw["w_hh"].shape[1]
    T = raw["w_gen"].shape[0]
    Vp = _round_up(V, _LANE)
    Ep = _round_up(E, _LANE)
    Hp = _round_up(H, _LANE)
    Tp = _round_up(T, _LANE)

    # PyTorch gate order i, f, g, o -> double only the g-gate pre-activation.
    gate_scale = jnp.concatenate([jnp.ones((H,), jnp.float32),
                                  jnp.ones((H,), jnp.float32),
                                  2.0 * jnp.ones((H,), jnp.float32),
                                  jnp.ones((H,), jnp.float32)])

    def pad_gate_cols(w_t):  # (in, 4H) -> (in, 4Hp), each gate block zero-padded
        w_t = w_t * gate_scale
        blocks = [jnp.pad(w_t[:, g * H:(g + 1) * H], ((0, 0), (0, Hp - H)))
                  for g in range(4)]
        return jnp.concatenate(blocks, axis=1)

    w_ih_t = jnp.pad(pad_gate_cols(raw["w_ih"].T), ((0, Ep - E), (0, 0)))  # (Ep, 4Hp)
    w_hh_t = jnp.pad(pad_gate_cols(raw["w_hh"].T), ((0, Hp - H), (0, 0)))  # (Hp, 4Hp)
    b = pad_gate_cols((raw["b_ih"] + raw["b_hh"])[None, :])                # (1, 4Hp)
    w_gen_t = jnp.pad(raw["w_gen"].T, ((0, Hp - H), (0, Tp - T)))          # (Hp, Tp)
    b_gen = jnp.pad(raw["b_gen"][None, :], ((0, 0), (0, Tp - T)),
                    constant_values=_NEG)                                  # (1, Tp)
    embedding = jnp.pad(raw["embedding"], ((0, Vp - V), (0, Ep - E)))      # (Vp, Ep)
    return {
        "embedding": embedding,
        "w_ih_t": w_ih_t, "w_hh_t": w_hh_t, "b": b,
        "w_gen_t": w_gen_t, "b_gen": b_gen,
        "tagset_size": T, "hidden_dim": H,
    }


def _reference_forward(sentence, raw, gumbel_noise, tau):
    """Pure-JAX reference matching the PyTorch module (soft gumbel-softmax)."""
    H = raw["w_hh"].shape[1]
    emb = raw["embedding"][sentence]
    w_ih_t, w_hh_t = raw["w_ih"].T, raw["w_hh"].T
    b = raw["b_ih"] + raw["b_hh"]

    def step(carry, x):
        h, c = carry
        g = x @ w_ih_t + h @ w_hh_t + b
        i = jax.nn.sigmoid(g[0:H])
        f = jax.nn.sigmoid(g[H:2 * H])
        gg = jnp.tanh(g[2 * H:3 * H])
        o = jax.nn.sigmoid(g[3 * H:4 * H])
        c = f * c + i * gg
        h = o * jnp.tanh(c)
        return (h, c), h

    (_, _), hs = lax.scan(step, (jnp.zeros((H,)), jnp.zeros((H,))), emb)
    logits = hs @ raw["w_gen"].T + raw["b_gen"]
    return jax.nn.softmax((logits + gumbel_noise) / tau, axis=-1)


if __name__ == "__main__":
    vocab_size, embedding_dim, hidden_dim, tagset_size = 32, 16, 32, 16
    seq_len = 8

    key = jax.random.PRNGKey(0)
    k_param, k_tok, k_gumbel = jax.random.split(key, 3)

    raw = init_params(k_param, vocab_size, embedding_dim, hidden_dim, tagset_size)
    params = pack_params(raw)

    sentence = jax.random.randint(k_tok, (seq_len,), 0, vocab_size, dtype=jnp.int32)
    # Gumbel noise sampled deterministically outside the kernel (same
    # distribution as torch.nn.functional.gumbel_softmax's internal sampling).
    gumbel_noise = jax.random.gumbel(k_gumbel, (seq_len, tagset_size), jnp.float32)

    scores = generative_model_rnn_forward(sentence, params, gumbel_noise, tau=0.5)
    scores = jax.block_until_ready(scores)

    assert scores.shape == (seq_len, tagset_size)
    assert bool(jnp.all(jnp.isfinite(scores)))
    assert bool(jnp.allclose(jnp.sum(scores, axis=-1), 1.0, atol=1e-3))

    # Cross-check against the pure-JAX reference (MXU default precision on the
    # kernel matmuls -> modest tolerance on probabilities).
    ref = _reference_forward(sentence, raw, gumbel_noise, 0.5)
    assert bool(jnp.allclose(scores, ref, atol=2e-2)), float(jnp.max(jnp.abs(scores - ref)))
    print("KERNEL_OK")
</pallas_src>

<mosaic_0001>
module attributes {stable_mosaic.version = 11 : i64} {
  func.func @_lstm_gen_kernel(%arg0: i32, %arg1: memref<8x1xi32, #tpu.memory_space<vmem>>, %arg2: memref<128x128xf32, #tpu.memory_space<vmem>>, %arg3: memref<128x512xf32, #tpu.memory_space<vmem>>, %arg4: memref<128x512xf32, #tpu.memory_space<vmem>>, %arg5: memref<1x512xf32, #tpu.memory_space<vmem>>, %arg6: memref<128x128xf32, #tpu.memory_space<vmem>>, %arg7: memref<1x128xf32, #tpu.memory_space<vmem>>, %arg8: memref<8x128xf32, #tpu.memory_space<vmem>>, %arg9: memref<8x128xf32, #tpu.memory_space<vmem>>, %arg10: memref<8x512xf32, #tpu.memory_space<vmem>>, %arg11: memref<8x128xf32, #tpu.memory_space<vmem>>) attributes {dimension_semantics = [#tpu.dimension_semantics<arbitrary>], iteration_bounds = array<i64: 1>, scalar_prefetch = 0 : i64, scratch_operands = 2 : i64, tpu.core_type = #tpu.core_type<tc>, window_params = [{pipeline_mode = #tpu.pipeline_mode<synchronous>, transform_indices = @transform_0, window_bounds = array<i64: 8, 1>}, {pipeline_mode = #tpu.pipeline_mode<synchronous>, transform_indices = @transform_1, window_bounds = array<i64: 128, 128>}, {pipeline_mode = #tpu.pipeline_mode<synchronous>, transform_indices = @transform_2, window_bounds = array<i64: 128, 512>}, {pipeline_mode = #tpu.pipeline_mode<synchronous>, transform_indices = @transform_3, window_bounds = array<i64: 128, 512>}, {pipeline_mode = #tpu.pipeline_mode<synchronous>, transform_indices = @transform_4, window_bounds = array<i64: 1, 512>}, {pipeline_mode = #tpu.pipeline_mode<synchronous>, transform_indices = @transform_5, window_bounds = array<i64: 128, 128>}, {pipeline_mode = #tpu.pipeline_mode<synchronous>, transform_indices = @transform_6, window_bounds = array<i64: 1, 128>}, {pipeline_mode = #tpu.pipeline_mode<synchronous>, transform_indices = @transform_7, window_bounds = array<i64: 8, 128>}, {pipeline_mode = #tpu.pipeline_mode<synchronous>, transform_indices = @transform_8, window_bounds = array<i64: 8, 128>}]} {
    %c0 = arith.constant 0 : index
    %c0_0 = arith.constant 0 : index
    %0 = vector.load %arg1[%c0, %c0_0] : memref<8x1xi32, #tpu.memory_space<vmem>>, vector<8x1xi32>
    %1 = tpu.iota {dimensions = array<i32: 1>} : vector<8x128xi32>
    %2 = vector.broadcast %0 : vector<8x1xi32> to vector<8x128xi32>
    %3 = arith.cmpi eq, %1, %2 : vector<8x128xi32>
    %4 = arith.extui %3 : vector<8x128xi1> to vector<8x128xi32>
    %5 = arith.sitofp %4 : vector<8x128xi32> to vector<8x128xf32>
    %c0_1 = arith.constant 0 : index
    %c0_2 = arith.constant 0 : index
    %6 = vector.load %arg2[%c0_1, %c0_2] : memref<128x128xf32, #tpu.memory_space<vmem>>, vector<128x128xf32>
    %cst = arith.constant dense<0.000000e+00> : vector<8x128xf32>
    %7 = tpu.matmul %5, %6, %cst {dimension_numbers = #tpu.dot_dimension_numbers<[1], [0], [0], [1], [0, 0, 1, 1], [], []>} : vector<8x128xf32>, vector<128x128xf32>, vector<8x128xf32> -> vector<8x128xf32>
    %c0_3 = arith.constant 0 : index
    %c0_4 = arith.constant 0 : index
    %8 = vector.load %arg3[%c0_3, %c0_4] : memref<128x512xf32, #tpu.memory_space<vmem>>, vector<128x512xf32>
    %cst_5 = arith.constant dense<0.000000e+00> : vector<8x512xf32>
    %9 = tpu.matmul %7, %8, %cst_5 {dimension_numbers = #tpu.dot_dimension_numbers<[1], [0], [0], [1], [0, 0, 1, 1], [], []>} : vector<8x128xf32>, vector<128x512xf32>, vector<8x512xf32> -> vector<8x512xf32>
    %c0_6 = arith.constant 0 : index
    %c0_7 = arith.constant 0 : index
    %10 = vector.load %arg5[%c0_6, %c0_7] : memref<1x512xf32, #tpu.memory_space<vmem>>, vector<1x512xf32>
    %11 = vector.broadcast %10 : vector<1x512xf32> to vector<8x512xf32>
    %12 = arith.addf %9, %11 : vector<8x512xf32>
    %c0_8 = arith.constant 0 : index
    %c0_9 = arith.constant 0 : index
    %13 = vector.load %arg10[%c0_8, %c0_9] : memref<8x512xf32, #tpu.memory_space<vmem>>, vector<8x512xf32>
    tpu.vector_store %arg10[%c0_8, %c0_9], %12 {strides = array<i32>} : memref<8x512xf32, #tpu.memory_space<vmem>>, vector<8x512xf32>,
    %cst_10 = arith.constant 0.000000e+00 : f32
    %14 = vector.broadcast %cst_10 : f32 to vector<1x128xf32>
    %c0_i32 = arith.constant 0 : i32
    %15 = arith.index_cast %c0_i32 : i32 to index
    %c0_11 = arith.constant 0 : index
    %16 = vector.load %arg10[%15, %c0_11] : memref<8x512xf32, #tpu.memory_space<vmem>>, vector<1x512xf32>
    %c0_12 = arith.constant 0 : index
    %c0_13 = arith.constant 0 : index
    %17 = vector.load %arg4[%c0_12, %c0_13] : memref<128x512xf32, #tpu.memory_space<vmem>>, vector<128x512xf32>
    %cst_14 = arith.constant dense<0.000000e+00> : vector<1x512xf32>
    %18 = tpu.matmul %14, %17, %cst_14 {dimension_numbers = #tpu.dot_dimension_numbers<[1], [0], [0], [1], [0, 0, 1, 1], [], []>} : vector<1x128xf32>, vector<128x512xf32>, vector<1x512xf32> -> vector<1x512xf32>
    %19 = arith.addf %16, %18 : vector<1x512xf32>
    %20 = arith.negf %19 : vector<1x512xf32>
    %21 = math.exp %20 : vector<1x512xf32>
    %cst_15 = arith.constant 1.000000e+00 : f32
    %22 = vector.broadcast %cst_15 : f32 to vector<1x512xf32>
    %23 = arith.addf %22, %21 : vector<1x512xf32>
    %24 = arith.divf %22, %23 : vector<1x512xf32>
    %25 = vector.extract_strided_slice %24 {offsets = [0, 0], sizes = [1, 128], strides = [1, 1]} : vector<1x512xf32> to vector<1x128xf32>
    %26 = vector.extract_strided_slice %24 {offsets = [0, 128], sizes = [1, 128], strides = [1, 1]} : vector<1x512xf32> to vector<1x128xf32>
    %27 = vector.extract_strided_slice %24 {offsets = [0, 256], sizes = [1, 128], strides = [1, 1]} : vector<1x512xf32> to vector<1x128xf32>
    %cst_16 = arith.constant 2.000000e+00 : f32
    %28 = vector.broadcast %cst_16 : f32 to vector<1x128xf32>
    %29 = arith.mulf %28, %27 : vector<1x128xf32>
    %cst_17 = arith.constant 1.000000e+00 : f32
    %30 = vector.broadcast %cst_17 : f32 to vector<1x128xf32>
    %31 = arith.subf %29, %30 : vector<1x128xf32>
    %32 = vector.extract_strided_slice %24 {offsets = [0, 384], sizes = [1, 128], strides = [1, 1]} : vector<1x512xf32> to vector<1x128xf32>
    %33 = arith.mulf %26, %14 : vector<1x128xf32>
    %34 = arith.mulf %25, %31 : vector<1x128xf32>
    %35 = arith.addf %33, %34 : vector<1x128xf32>
    %36 = math.tanh %35 : vector<1x128xf32>
    %37 = arith.mulf %32, %36 : vector<1x128xf32>
    %38 = arith.index_cast %c0_i32 : i32 to index
    %c0_18 = arith.constant 0 : index
    %39 = vector.load %arg11[%38, %c0_18] : memref<8x128xf32, #tpu.memory_space<vmem>>, vector<1x128xf32>
    tpu.vector_store %arg11[%38, %c0_18], %37 {strides = array<i32>} : memref<8x128xf32, #tpu.memory_space<vmem>>, vector<1x128xf32>,
    %c1_i32 = arith.constant 1 : i32
    %40 = arith.index_cast %c1_i32 : i32 to index
    %c0_19 = arith.constant 0 : index
    %41 = vector.load %arg10[%40, %c0_19] : memref<8x512xf32, #tpu.memory_space<vmem>>, vector<1x512xf32>
    %c0_20 = arith.constant 0 : index
    %c0_21 = arith.constant 0 : index
    %42 = vector.load %arg4[%c0_20, %c0_21] : memref<128x512xf32, #tpu.memory_space<vmem>>, vector<128x512xf32>
    %cst_22 = arith.constant dense<0.000000e+00> : vector<1x512xf32>
    %43 = tpu.matmul %37, %42, %cst_22 {dimension_numbers = #tpu.dot_dimension_numbers<[1], [0], [0], [1], [0, 0, 1, 1], [], []>} : vector<1x128xf32>, vector<128x512xf32>, vector<1x512xf32> -> vector<1x512xf32>
    %44 = arith.addf %41, %43 : vector<1x512xf32>
    %45 = arith.negf %44 : vector<1x512xf32>
    %46 = math.exp %45 : vector<1x512xf32>
    %cst_23 = arith.constant 1.000000e+00 : f32
    %47 = vector.broadcast %cst_23 : f32 to vector<1x512xf32>
    %48 = arith.addf %47, %46 : vector<1x512xf32>
    %49 = arith.divf %47, %48 : vector<1x512xf32>
    %50 = vector.extract_strided_slice %49 {offsets = [0, 0], sizes = [1, 128], strides = [1, 1]} : vector<1x512xf32> to vector<1x128xf32>
    %51 = vector.extract_strided_slice %49 {offsets = [0, 128], sizes = [1, 128], strides = [1, 1]} : vector<1x512xf32> to vector<1x128xf32>
    %52 = vector.extract_strided_slice %49 {offsets = [0, 256], sizes = [1, 128], strides = [1, 1]} : vector<1x512xf32> to vector<1x128xf32>
    %cst_24 = arith.constant 2.000000e+00 : f32
    %53 = vector.broadcast %cst_24 : f32 to vector<1x128xf32>
    %54 = arith.mulf %53, %52 : vector<1x128xf32>
    %cst_25 = arith.constant 1.000000e+00 : f32
    %55 = vector.broadcast %cst_25 : f32 to vector<1x128xf32>
    %56 = arith.subf %54, %55 : vector<1x128xf32>
    %57 = vector.extract_strided_slice %49 {offsets = [0, 384], sizes = [1, 128], strides = [1, 1]} : vector<1x512xf32> to vector<1x128xf32>
    %58 = arith.mulf %51, %35 : vector<1x128xf32>
    %59 = arith.mulf %50, %56 : vector<1x128xf32>
    %60 = arith.addf %58, %59 : vector<1x128xf32>
    %61 = math.tanh %60 : vector<1x128xf32>
    %62 = arith.mulf %57, %61 : vector<1x128xf32>
    %63 = arith.index_cast %c1_i32 : i32 to index
    %c0_26 = arith.constant 0 : index
    %64 = vector.load %arg11[%63, %c0_26] : memref<8x128xf32, #tpu.memory_space<vmem>>, vector<1x128xf32>
    tpu.vector_store %arg11[%63, %c0_26], %62 {strides = array<i32>} : memref<8x128xf32, #tpu.memory_space<vmem>>, vector<1x128xf32>,
    %c2_i32 = arith.constant 2 : i32
    %65 = arith.index_cast %c2_i32 : i32 to index
    %c0_27 = arith.constant 0 : index
    %66 = vector.load %arg10[%65, %c0_27] : memref<8x512xf32, #tpu.memory_space<vmem>>, vector<1x512xf32>
    %c0_28 = arith.constant 0 : index
    %c0_29 = arith.constant 0 : index
    %67 = vector.load %arg4[%c0_28, %c0_29] : memref<128x512xf32, #tpu.memory_space<vmem>>, vector<128x512xf32>
    %cst_30 = arith.constant dense<0.000000e+00> : vector<1x512xf32>
    %68 = tpu.matmul %62, %67, %cst_30 {dimension_numbers = #tpu.dot_dimension_numbers<[1], [0], [0], [1], [0, 0, 1, 1], [], []>} : vector<1x128xf32>, vector<128x512xf32>, vector<1x512xf32> -> vector<1x512xf32>
    %69 = arith.addf %66, %68 : vector<1x512xf32>
    %70 = arith.negf %69 : vector<1x512xf32>
    %71 = math.exp %70 : vector<1x512xf32>
    %cst_31 = arith.constant 1.000000e+00 : f32
    %72 = vector.broadcast %cst_31 : f32 to vector<1x512xf32>
    %73 = arith.addf %72, %71 : vector<1x512xf32>
    %74 = arith.divf %72, %73 : vector<1x512xf32>
    %75 = vector.extract_strided_slice %74 {offsets = [0, 0], sizes = [1, 128], strides = [1, 1]} : vector<1x512xf32> to vector<1x128xf32>
    %76 = vector.extract_strided_slice %74 {offsets = [0, 128], sizes = [1, 128], strides = [1, 1]} : vector<1x512xf32> to vector<1x128xf32>
    %77 = vector.extract_strided_slice %74 {offsets = [0, 256], sizes = [1, 128], strides = [1, 1]} : vector<1x512xf32> to vector<1x128xf32>
    %cst_32 = arith.constant 2.000000e+00 : f32
    %78 = vector.broadcast %cst_32 : f32 to vector<1x128xf32>
    %79 = arith.mulf %78, %77 : vector<1x128xf32>
    %cst_33 = arith.constant 1.000000e+00 : f32
    %80 = vector.broadcast %cst_33 : f32 to vector<1x128xf32>
    %81 = arith.subf %79, %80 : vector<1x128xf32>
    %82 = vector.extract_strided_slice %74 {offsets = [0, 384], sizes = [1, 128], strides = [1, 1]} : vector<1x512xf32> to vector<1x128xf32>
    %83 = arith.mulf %76, %60 : vector<1x128xf32>
    %84 = arith.mulf %75, %81 : vector<1x128xf32>
    %85 = arith.addf %83, %84 : vector<1x128xf32>
    %86 = math.tanh %85 : vector<1x128xf32>
    %87 = arith.mulf %82, %86 : vector<1x128xf32>
    %88 = arith.index_cast %c2_i32 : i32 to index
    %c0_34 = arith.constant 0 : index
    %89 = vector.load %arg11[%88, %c0_34] : memref<8x128xf32, #tpu.memory_space<vmem>>, vector<1x128xf32>
    tpu.vector_store %arg11[%88, %c0_34], %87 {strides = array<i32>} : memref<8x128xf32, #tpu.memory_space<vmem>>, vector<1x128xf32>,
    %c3_i32 = arith.constant 3 : i32
    %90 = arith.index_cast %c3_i32 : i32 to index
    %c0_35 = arith.constant 0 : index
    %91 = vector.load %arg10[%90, %c0_35] : memref<8x512xf32, #tpu.memory_space<vmem>>, vector<1x512xf32>
    %c0_36 = arith.constant 0 : index
    %c0_37 = arith.constant 0 : index
    %92 = vector.load %arg4[%c0_36, %c0_37] : memref<128x512xf32, #tpu.memory_space<vmem>>, vector<128x512xf32>
    %cst_38 = arith.constant dense<0.000000e+00> : vector<1x512xf32>
    %93 = tpu.matmul %87, %92, %cst_38 {dimension_numbers = #tpu.dot_dimension_numbers<[1], [0], [0], [1], [0, 0, 1, 1], [], []>} : vector<1x128xf32>, vector<128x512xf32>, vector<1x512xf32> -> vector<1x512xf32>
    %94 = arith.addf %91, %93 : vector<1x512xf32>
    %95 = arith.negf %94 : vector<1x512xf32>
    %96 = math.exp %95 : vector<1x512xf32>
    %cst_39 = arith.constant 1.000000e+00 : f32
    %97 = vector.broadcast %cst_39 : f32 to vector<1x512xf32>
    %98 = arith.addf %97, %96 : vector<1x512xf32>
    %99 = arith.divf %97, %98 : vector<1x512xf32>
    %100 = vector.extract_strided_slice %99 {offsets = [0, 0], sizes = [1, 128], strides = [1, 1]} : vector<1x512xf32> to vector<1x128xf32>
    %101 = vector.extract_strided_slice %99 {offsets = [0, 128], sizes = [1, 128], strides = [1, 1]} : vector<1x512xf32> to vector<1x128xf32>
    %102 = vector.extract_strided_slice %99 {offsets = [0, 256], sizes = [1, 128], strides = [1, 1]} : vector<1x512xf32> to vector<1x128xf32>
    %cst_40 = arith.constant 2.000000e+00 : f32
    %103 = vector.broadcast %cst_40 : f32 to vector<1x128xf32>
    %104 = arith.mulf %103, %102 : vector<1x128xf32>
    %cst_41 = arith.constant 1.000000e+00 : f32
    %105 = vector.broadcast %cst_41 : f32 to vector<1x128xf32>
    %106 = arith.subf %104, %105 : vector<1x128xf32>
    %107 = vector.extract_strided_slice %99 {offsets = [0, 384], sizes = [1, 128], strides = [1, 1]} : vector<1x512xf32> to vector<1x128xf32>
    %108 = arith.mulf %101, %85 : vector<1x128xf32>
    %109 = arith.mulf %100, %106 : vector<1x128xf32>
    %110 = arith.addf %108, %109 : vector<1x128xf32>
    %111 = math.tanh %110 : vector<1x128xf32>
    %112 = arith.mulf %107, %111 : vector<1x128xf32>
    %113 = arith.index_cast %c3_i32 : i32 to index
    %c0_42 = arith.constant 0 : index
    %114 = vector.load %arg11[%113, %c0_42] : memref<8x128xf32, #tpu.memory_space<vmem>>, vector<1x128xf32>
    tpu.vector_store %arg11[%113, %c0_42], %112 {strides = array<i32>} : memref<8x128xf32, #tpu.memory_space<vmem>>, vector<1x128xf32>,
    %c4_i32 = arith.constant 4 : i32
    %115 = arith.index_cast %c4_i32 : i32 to index
    %c0_43 = arith.constant 0 : index
    %116 = vector.load %arg10[%115, %c0_43] : memref<8x512xf32, #tpu.memory_space<vmem>>, vector<1x512xf32>
    %c0_44 = arith.constant 0 : index
    %c0_45 = arith.constant 0 : index
    %117 = vector.load %arg4[%c0_44, %c0_45] : memref<128x512xf32, #tpu.memory_space<vmem>>, vector<128x512xf32>
    %cst_46 = arith.constant dense<0.000000e+00> : vector<1x512xf32>
    %118 = tpu.matmul %112, %117, %cst_46 {dimension_numbers = #tpu.dot_dimension_numbers<[1], [0], [0], [1], [0, 0, 1, 1], [], []>} : vector<1x128xf32>, vector<128x512xf32>, vector<1x512xf32> -> vector<1x512xf32>
    %119 = arith.addf %116, %118 : vector<1x512xf32>
    %120 = arith.negf %119 : vector<1x512xf32>
    %121 = math.exp %120 : vector<1x512xf32>
    %cst_47 = arith.constant 1.000000e+00 : f32
    %122 = vector.broadcast %cst_47 : f32 to vector<1x512xf32>
    %123 = arith.addf %122, %121 : vector<1x512xf32>
    %124 = arith.divf %122, %123 : vector<1x512xf32>
    %125 = vector.extract_strided_slice %124 {offsets = [0, 0], sizes = [1, 128], strides = [1, 1]} : vector<1x512xf32> to vector<1x128xf32>
    %126 = vector.extract_strided_slice %124 {offsets = [0, 128], sizes = [1, 128], strides = [1, 1]} : vector<1x512xf32> to vector<1x128xf32>
    %127 = vector.extract_strided_slice %124 {offsets = [0, 256], sizes = [1, 128], strides = [1, 1]} : vector<1x512xf32> to vector<1x128xf32>
    %cst_48 = arith.constant 2.000000e+00 : f32
    %128 = vector.broadcast %cst_48 : f32 to vector<1x128xf32>
    %129 = arith.mulf %128, %127 : vector<1x128xf32>
    %cst_49 = arith.constant 1.000000e+00 : f32
    %130 = vector.broadcast %cst_49 : f32 to vector<1x128xf32>
    %131 = arith.subf %129, %130 : vector<1x128xf32>
    %132 = vector.extract_strided_slice %124 {offsets = [0, 384], sizes = [1, 128], strides = [1, 1]} : vector<1x512xf32> to vector<1x128xf32>
    %133 = arith.mulf %126, %110 : vector<1x128xf32>
    %134 = arith.mulf %125, %131 : vector<1x128xf32>
    %135 = arith.addf %133, %134 : vector<1x128xf32>
    %136 = math.tanh %135 : vector<1x128xf32>
    %137 = arith.mulf %132, %136 : vector<1x128xf32>
    %138 = arith.index_cast %c4_i32 : i32 to index
    %c0_50 = arith.constant 0 : index
    %139 = vector.load %arg11[%138, %c0_50] : memref<8x128xf32, #tpu.memory_space<vmem>>, vector<1x128xf32>
    tpu.vector_store %arg11[%138, %c0_50], %137 {strides = array<i32>} : memref<8x128xf32, #tpu.memory_space<vmem>>, vector<1x128xf32>,
    %c5_i32 = arith.constant 5 : i32
    %140 = arith.index_cast %c5_i32 : i32 to index
    %c0_51 = arith.constant 0 : index
    %141 = vector.load %arg10[%140, %c0_51] : memref<8x512xf32, #tpu.memory_space<vmem>>, vector<1x512xf32>
    %c0_52 = arith.constant 0 : index
    %c0_53 = arith.constant 0 : index
    %142 = vector.load %arg4[%c0_52, %c0_53] : memref<128x512xf32, #tpu.memory_space<vmem>>, vector<128x512xf32>
    %cst_54 = arith.constant dense<0.000000e+00> : vector<1x512xf32>
    %143 = tpu.matmul %137, %142, %cst_54 {dimension_numbers = #tpu.dot_dimension_numbers<[1], [0], [0], [1], [0, 0, 1, 1], [], []>} : vector<1x128xf32>, vector<128x512xf32>, vector<1x512xf32> -> vector<1x512xf32>
    %144 = arith.addf %141, %143 : vector<1x512xf32>
    %145 = arith.negf %144 : vector<1x512xf32>
    %146 = math.exp %145 : vector<1x512xf32>
    %cst_55 = arith.constant 1.000000e+00 : f32
    %147 = vector.broadcast %cst_55 : f32 to vector<1x512xf32>
    %148 = arith.addf %147, %146 : vector<1x512xf32>
    %149 = arith.divf %147, %148 : vector<1x512xf32>
    %150 = vector.extract_strided_slice %149 {offsets = [0, 0], sizes = [1, 128], strides = [1, 1]} : vector<1x512xf32> to vector<1x128xf32>
    %151 = vector.extract_strided_slice %149 {offsets = [0, 128], sizes = [1, 128], strides = [1, 1]} : vector<1x512xf32> to vector<1x128xf32>
    %152 = vector.extract_strided_slice %149 {offsets = [0, 256], sizes = [1, 128], strides = [1, 1]} : vector<1x512xf32> to vector<1x128xf32>
    %cst_56 = arith.constant 2.000000e+00 : f32
    %153 = vector.broadcast %cst_56 : f32 to vector<1x128xf32>
    %154 = arith.mulf %153, %152 : vector<1x128xf32>
    %cst_57 = arith.constant 1.000000e+00 : f32
    %155 = vector.broadcast %cst_57 : f32 to vector<1x128xf32>
    %156 = arith.subf %154, %155 : vector<1x128xf32>
    %157 = vector.extract_strided_slice %149 {offsets = [0, 384], sizes = [1, 128], strides = [1, 1]} : vector<1x512xf32> to vector<1x128xf32>
    %158 = arith.mulf %151, %135 : vector<1x128xf32>
    %159 = arith.mulf %150, %156 : vector<1x128xf32>
    %160 = arith.addf %158, %159 : vector<1x128xf32>
    %161 = math.tanh %160 : vector<1x128xf32>
    %162 = arith.mulf %157, %161 : vector<1x128xf32>
    %163 = arith.index_cast %c5_i32 : i32 to index
    %c0_58 = arith.constant 0 : index
    %164 = vector.load %arg11[%163, %c0_58] : memref<8x128xf32, #tpu.memory_space<vmem>>, vector<1x128xf32>
    tpu.vector_store %arg11[%163, %c0_58], %162 {strides = array<i32>} : memref<8x128xf32, #tpu.memory_space<vmem>>, vector<1x128xf32>,
    %c6_i32 = arith.constant 6 : i32
    %165 = arith.index_cast %c6_i32 : i32 to index
    %c0_59 = arith.constant 0 : index
    %166 = vector.load %arg10[%165, %c0_59] : memref<8x512xf32, #tpu.memory_space<vmem>>, vector<1x512xf32>
    %c0_60 = arith.constant 0 : index
    %c0_61 = arith.constant 0 : index
    %167 = vector.load %arg4[%c0_60, %c0_61] : memref<128x512xf32, #tpu.memory_space<vmem>>, vector<128x512xf32>
    %cst_62 = arith.constant dense<0.000000e+00> : vector<1x512xf32>
    %168 = tpu.matmul %162, %167, %cst_62 {dimension_numbers = #tpu.dot_dimension_numbers<[1], [0], [0], [1], [0, 0, 1, 1], [], []>} : vector<1x128xf32>, vector<128x512xf32>, vector<1x512xf32> -> vector<1x512xf32>
    %169 = arith.addf %166, %168 : vector<1x512xf32>
    %170 = arith.negf %169 : vector<1x512xf32>
    %171 = math.exp %170 : vector<1x512xf32>
    %cst_63 = arith.constant 1.000000e+00 : f32
    %172 = vector.broadcast %cst_63 : f32 to vector<1x512xf32>
    %173 = arith.addf %172, %171 : vector<1x512xf32>
    %174 = arith.divf %172, %173 : vector<1x512xf32>
    %175 = vector.extract_strided_slice %174 {offsets = [0, 0], sizes = [1, 128], strides = [1, 1]} : vector<1x512xf32> to vector<1x128xf32>
    %176 = vector.extract_strided_slice %174 {offsets = [0, 128], sizes = [1, 128], strides = [1, 1]} : vector<1x512xf32> to vector<1x128xf32>
    %177 = vector.extract_strided_slice %174 {offsets = [0, 256], sizes = [1, 128], strides = [1, 1]} : vector<1x512xf32> to vector<1x128xf32>
    %cst_64 = arith.constant 2.000000e+00 : f32
    %178 = vector.broadcast %cst_64 : f32 to vector<1x128xf32>
    %179 = arith.mulf %178, %177 : vector<1x128xf32>
    %cst_65 = arith.constant 1.000000e+00 : f32
    %180 = vector.broadcast %cst_65 : f32 to vector<1x128xf32>
    %181 = arith.subf %179, %180 : vector<1x128xf32>
    %182 = vector.extract_strided_slice %174 {offsets = [0, 384], sizes = [1, 128], strides = [1, 1]} : vector<1x512xf32> to vector<1x128xf32>
    %183 = arith.mulf %176, %160 : vector<1x128xf32>
    %184 = arith.mulf %175, %181 : vector<1x128xf32>
    %185 = arith.addf %183, %184 : vector<1x128xf32>
    %186 = math.tanh %185 : vector<1x128xf32>
    %187 = arith.mulf %182, %186 : vector<1x128xf32>
    %188 = arith.index_cast %c6_i32 : i32 to index
    %c0_66 = arith.constant 0 : index
    %189 = vector.load %arg11[%188, %c0_66] : memref<8x128xf32, #tpu.memory_space<vmem>>, vector<1x128xf32>
    tpu.vector_store %arg11[%188, %c0_66], %187 {strides = array<i32>} : memref<8x128xf32, #tpu.memory_space<vmem>>, vector<1x128xf32>,
    %c7_i32 = arith.constant 7 : i32
    %190 = arith.index_cast %c7_i32 : i32 to index
    %c0_67 = arith.constant 0 : index
    %191 = vector.load %arg10[%190, %c0_67] : memref<8x512xf32, #tpu.memory_space<vmem>>, vector<1x512xf32>
    %c0_68 = arith.constant 0 : index
    %c0_69 = arith.constant 0 : index
    %192 = vector.load %arg4[%c0_68, %c0_69] : memref<128x512xf32, #tpu.memory_space<vmem>>, vector<128x512xf32>
    %cst_70 = arith.constant dense<0.000000e+00> : vector<1x512xf32>
    %193 = tpu.matmul %187, %192, %cst_70 {dimension_numbers = #tpu.dot_dimension_numbers<[1], [0], [0], [1], [0, 0, 1, 1], [], []>} : vector<1x128xf32>, vector<128x512xf32>, vector<1x512xf32> -> vector<1x512xf32>
    %194 = arith.addf %191, %193 : vector<1x512xf32>
    %195 = arith.negf %194 : vector<1x512xf32>
    %196 = math.exp %195 : vector<1x512xf32>
    %cst_71 = arith.constant 1.000000e+00 : f32
    %197 = vector.broadcast %cst_71 : f32 to vector<1x512xf32>
    %198 = arith.addf %197, %196 : vector<1x512xf32>
    %199 = arith.divf %197, %198 : vector<1x512xf32>
    %200 = vector.extract_strided_slice %199 {offsets = [0, 0], sizes = [1, 128], strides = [1, 1]} : vector<1x512xf32> to vector<1x128xf32>
    %201 = vector.extract_strided_slice %199 {offsets = [0, 128], sizes = [1, 128], strides = [1, 1]} : vector<1x512xf32> to vector<1x128xf32>
    %202 = vector.extract_strided_slice %199 {offsets = [0, 256], sizes = [1, 128], strides = [1, 1]} : vector<1x512xf32> to vector<1x128xf32>
    %cst_72 = arith.constant 2.000000e+00 : f32
    %203 = vector.broadcast %cst_72 : f32 to vector<1x128xf32>
    %204 = arith.mulf %203, %202 : vector<1x128xf32>
    %cst_73 = arith.constant 1.000000e+00 : f32
    %205 = vector.broadcast %cst_73 : f32 to vector<1x128xf32>
    %206 = arith.subf %204, %205 : vector<1x128xf32>
    %207 = vector.extract_strided_slice %199 {offsets = [0, 384], sizes = [1, 128], strides = [1, 1]} : vector<1x512xf32> to vector<1x128xf32>
    %208 = arith.mulf %201, %185 : vector<1x128xf32>
    %209 = arith.mulf %200, %206 : vector<1x128xf32>
    %210 = arith.addf %208, %209 : vector<1x128xf32>
    %211 = math.tanh %210 : vector<1x128xf32>
    %212 = arith.mulf %207, %211 : vector<1x128xf32>
    %213 = arith.index_cast %c7_i32 : i32 to index
    %c0_74 = arith.constant 0 : index
    %214 = vector.load %arg11[%213, %c0_74] : memref<8x128xf32, #tpu.memory_space<vmem>>, vector<1x128xf32>
    tpu.vector_store %arg11[%213, %c0_74], %212 {strides = array<i32>} : memref<8x128xf32, #tpu.memory_space<vmem>>, vector<1x128xf32>,
    %c8_i32 = arith.constant 8 : i32
    %c0_75 = arith.constant 0 : index
    %c0_76 = arith.constant 0 : index
    %215 = vector.load %arg11[%c0_75, %c0_76] : memref<8x128xf32, #tpu.memory_space<vmem>>, vector<8x128xf32>
    %c0_77 = arith.constant 0 : index
    %c0_78 = arith.constant 0 : index
    %216 = vector.load %arg6[%c0_77, %c0_78] : memref<128x128xf32, #tpu.memory_space<vmem>>, vector<128x128xf32>
    %cst_79 = arith.constant dense<0.000000e+00> : vector<8x128xf32>
    %217 = tpu.matmul %215, %216, %cst_79 {dimension_numbers = #tpu.dot_dimension_numbers<[1], [0], [0], [1], [0, 0, 1, 1], [], []>} : vector<8x128xf32>, vector<128x128xf32>, vector<8x128xf32> -> vector<8x128xf32>
    %c0_80 = arith.constant 0 : index
    %c0_81 = arith.constant 0 : index
    %218 = vector.load %arg7[%c0_80, %c0_81] : memref<1x128xf32, #tpu.memory_space<vmem>>, vector<1x128xf32>
    %219 = vector.broadcast %218 : vector<1x128xf32> to vector<8x128xf32>
    %220 = arith.addf %217, %219 : vector<8x128xf32>
    %c0_82 = arith.constant 0 : index
    %c0_83 = arith.constant 0 : index
    %221 = vector.load %arg8[%c0_82, %c0_83] : memref<8x128xf32, #tpu.memory_space<vmem>>, vector<8x128xf32>
    %222 = arith.addf %220, %221 : vector<8x128xf32>
    %cst_84 = arith.constant 2.000000e+00 : f32
    %223 = vector.broadcast %cst_84 : f32 to vector<8x128xf32>
    %224 = arith.mulf %222, %223 : vector<8x128xf32>
    %cst_85 = arith.constant dense<0xFF800000> : vector<8xf32>
    %225 = vector.multi_reduction <maximumf>, %224, %cst_85 [1] : vector<8x128xf32> to vector<8xf32>
    %226 = vector.shape_cast %225 : vector<8xf32> to vector<8x1xf32>
    %227 = vector.broadcast %226 : vector<8x1xf32> to vector<8x128xf32>
    %228 = arith.subf %224, %227 : vector<8x128xf32>
    %229 = math.exp %228 : vector<8x128xf32>
    %cst_86 = arith.constant dense<0.000000e+00> : vector<8xf32>
    %230 = vector.multi_reduction <add>, %229, %cst_86 [1] : vector<8x128xf32> to vector<8xf32>
    %231 = vector.shape_cast %230 : vector<8xf32> to vector<8x1xf32>
    %232 = tpu.reciprocal %231 {approx = true} : vector<8x1xf32> -> vector<8x1xf32>
    %233 = arith.mulf %231, %232 : vector<8x1xf32>
    %cst_87 = arith.constant 2.000000e+00 : f32
    %234 = vector.broadcast %cst_87 : f32 to vector<8x1xf32>
    %235 = arith.subf %234, %233 : vector<8x1xf32>
    %236 = arith.mulf %232, %235 : vector<8x1xf32>
    %237 = vector.broadcast %236 : vector<8x1xf32> to vector<8x128xf32>
    %238 = arith.mulf %229, %237 : vector<8x128xf32>
    %c0_88 = arith.constant 0 : index
    %c0_89 = arith.constant 0 : index
    %239 = vector.load %arg9[%c0_88, %c0_89] : memref<8x128xf32, #tpu.memory_space<vmem>>, vector<8x128xf32>
    tpu.vector_store %arg9[%c0_88, %c0_89], %238 {strides = array<i32>} : memref<8x128xf32, #tpu.memory_space<vmem>>, vector<8x128xf32>,
    return
  }
  func.func @transform_0(%arg0: i32) -> (i32, i32) {
    %c0_i32 = arith.constant 0 : i32
    %c0_i32_0 = arith.constant 0 : i32
    %c0_i32_1 = arith.constant 0 : i32
    return %c0_i32, %c0_i32_0 : i32, i32
  }
  func.func @transform_1(%arg0: i32) -> (i32, i32) {
    %c0_i32 = arith.constant 0 : i32
    %c0_i32_0 = arith.constant 0 : i32
    %c0_i32_1 = arith.constant 0 : i32
    return %c0_i32, %c0_i32_0 : i32, i32
  }
  func.func @transform_2(%arg0: i32) -> (i32, i32) {
    %c0_i32 = arith.constant 0 : i32
    %c0_i32_0 = arith.constant 0 : i32
    %c0_i32_1 = arith.constant 0 : i32
    return %c0_i32, %c0_i32_0 : i32, i32
  }
  func.func @transform_3(%arg0: i32) -> (i32, i32) {
    %c0_i32 = arith.constant 0 : i32
    %c0_i32_0 = arith.constant 0 : i32
    %c0_i32_1 = arith.constant 0 : i32
    return %c0_i32, %c0_i32_0 : i32, i32
  }
  func.func @transform_4(%arg0: i32) -> (i32, i32) {
    %c0_i32 = arith.constant 0 : i32
    %c0_i32_0 = arith.constant 0 : i32
    %c0_i32_1 = arith.constant 0 : i32
    return %c0_i32, %c0_i32_0 : i32, i32
  }
  func.func @transform_5(%arg0: i32) -> (i32, i32) {
    %c0_i32 = arith.constant 0 : i32
    %c0_i32_0 = arith.constant 0 : i32
    %c0_i32_1 = arith.constant 0 : i32
    return %c0_i32, %c0_i32_0 : i32, i32
  }
  func.func @transform_6(%arg0: i32) -> (i32, i32) {
    %c0_i32 = arith.constant 0 : i32
    %c0_i32_0 = arith.constant 0 : i32
    %c0_i32_1 = arith.constant 0 : i32
    return %c0_i32, %c0_i32_0 : i32, i32
  }
  func.func @transform_7(%arg0: i32) -> (i32, i32) {
    %c0_i32 = arith.constant 0 : i32
    %c0_i32_0 = arith.constant 0 : i32
    %c0_i32_1 = arith.constant 0 : i32
    return %c0_i32, %c0_i32_0 : i32, i32
  }
  func.func @transform_8(%arg0: i32) -> (i32, i32) {
    %c0_i32 = arith.constant 0 : i32
    %c0_i32_0 = arith.constant 0 : i32
    %c0_i32_1 = arith.constant 0 : i32
    return %c0_i32, %c0_i32_0 : i32, i32
  }
}

</mosaic_0001>

<bundles_post_ra>
// kernel: tpu_custom_call.1
= control target key start
LH: loop header
LB: loop body
LE: loop exit
PB: predicated region body
PF: predicated region fallthrough
CT: control target
= control target key end

     0   :  { %13 = vsyncpa [#allocation5], 0  ;;  %s4170_s0 = inlined_call_operand.vmem [shape: s32[8,1], index: 0, kind: input, shape index: {}]   ;;  %s4171_s1 = inlined_call_operand.hbm [shape: f32[128,128], index: 1, kind: input, shape index: {}]   ;;  %s4172_s2 = inlined_call_operand.hbm [shape: f32[128,512], index: 2, kind: input, shape index: {}]   ;;  %s4173_s3 = inlined_call_operand.hbm [shape: f32[128,512], index: 3, kind: input, shape index: {}]   ;;  %s4174_s4 = inlined_call_operand.vmem [shape: f32[1,512], index: 4, kind: input, shape index: {}]   ;;  %s4175_s5 = inlined_call_operand.hbm [shape: f32[128,128], index: 5, kind: input, shape index: {}]   ;;  %s4176_s6 = inlined_call_operand.vmem [shape: f32[1,128], index: 6, kind: input, shape index: {}]   ;;  %s4177_s7 = inlined_call_operand.vmem [shape: f32[8,128], index: 7, kind: input, shape index: {}]   ;;  %s4178_s8 = inlined_call_operand.hbm [shape: f32[8,128], index: 8, kind: output, shape index: {}]  }
   0x1   :  { %14 = vsyncpa [#allocation8], 0 }
   0x2   :  { %15 = vsyncpa [#allocation11], 0 }
   0x3   :  { %16 = vsyncpa [#allocation6], 0  ;;  %s3543_s27 = smov [#allocation7]   ;;  %s3425_s9 = scalar_lea.hbm %s4172_s2, 8192 }
   0x4   :  { %s36_s28 = sshll.u32 %s3543_s27, 4  ;;  %p3426_p0 = scmp.ne.s32.totalorder %s4172_s2, %s3425_s9  ;;  %s37_s28 = int_to_ptr.vmem [resolvable:$true] %s36_s28 }
   0x5   :  { %p3429_p1 = scmp.lt.u32.totalorder %s3425_s9, %s4172_s2 }
   0x7   :  { %p3431_p2 = pnand %p3429_p1, %p3426_p0 }
   0x9   :  { %3434 = shalt.err (!%p3431_p2)
}
   0xa   :  { %s3435_s14 = scalar_lea.vmem %s37_s28, 8192  ;;  %p3440_p4 = scmp.lt.s32.totalorder %s37_s28, %s37_s28 }
   0xb   :  { %p3436_p3 = scmp.ne.s32.totalorder %s37_s28, %s3435_s14  ;;  %p3441_p5 = scmp.lt.s32.totalorder %s3435_s14, %s3435_s14 }
   0xd   :  { %p3442_p6 = por %p3441_p5, %p3440_p4 }
   0xf   :  { %p3443_p7 = pnand %p3442_p6, %p3436_p3 }
  0x11   :  { %3446 = shalt.err (!%p3443_p7)
}
  0x12   :  { %s3544_s15 = smov 512   ;;  %s3545_s16 = smov 32  }
  0x13   :  { %42 = dma.hbm_to_vmem [thread:$0]  %s4172_s2, 8192, %s37_s28, [#allocation8], %s3544_s15, %s3544_s15, %s3545_s16  }
  0x14   :  { %s3546_s19 = smov [#allocation4]   ;;  %s3447_s23 = scalar_lea.hbm %s4171_s1, 2048 }
  0x15   :  { %s24_s20 = sshll.u32 %s3546_s19, 4  ;;  %p3448_p8 = scmp.ne.s32.totalorder %s4171_s1, %s3447_s23  ;;  %s25_s20 = int_to_ptr.vmem [resolvable:$true] %s24_s20 }
  0x16   :  { %p3451_p9 = scmp.lt.u32.totalorder %s3447_s23, %s4171_s1 }
  0x18   :  { %p3453_p10 = pnand %p3451_p9, %p3448_p8 }
  0x1a   :  { %3456 = shalt.err (!%p3453_p10)
}
  0x1b   :  { %s3457_s29 = scalar_lea.vmem %s25_s20, 2048  ;;  %p3462_p12 = scmp.lt.s32.totalorder %s25_s20, %s25_s20 }
  0x1c   :  { %p3458_p11 = scmp.ne.s32.totalorder %s25_s20, %s3457_s29  ;;  %p3463_p13 = scmp.lt.s32.totalorder %s3457_s29, %s3457_s29 }
  0x1e   :  { %p3464_p0 = por %p3463_p13, %p3462_p12 }
  0x20   :  { %p3465_p1 = pnand %p3464_p0, %p3458_p11 }
  0x22   :  { %3468 = shalt.err (!%p3465_p1)
}
  0x23   :  { %s3547_s2 = smov 128   ;;  %s3548_s28 = smov 8  }
  0x24   :  { %30 = dma.hbm_to_vmem [thread:$0]  %s4171_s1, 2048, %s25_s20, [#allocation5], %s3547_s2, %s3547_s2, %s3548_s28  }
  0x25   :  { %s3549_s10 = smov [#allocation9]   ;;  %s3550_s12 = smov [#allocation10]  }
  0x26   :  { %s48_s11 = sshll.u32 %s3549_s10, 4  ;;  %s62_s13 = sshll.u32 %s3550_s12, 4  ;;  %s49_s11 = int_to_ptr.vmem [resolvable:$true] %s48_s11  ;;  %s3633_s13 = int_to_ptr.vmem [resolvable:$true] %s62_s13 }
  0x27   :  { %s3469_s18 = scalar_lea.hbm %s4173_s3, 8192 }
  0x28   :  { %p3470_p2 = scmp.ne.s32.totalorder %s4173_s3, %s3469_s18  ;;  %p3473_p3 = scmp.lt.u32.totalorder %s3469_s18, %s4173_s3 }
  0x2a   :  { %p3475_p4 = pnand %p3473_p3, %p3470_p2 }
  0x2c   :  { %3478 = shalt.err (!%p3475_p4)
}
  0x2d   :  { %s3479_s1 = scalar_lea.vmem %s49_s11, 8192  ;;  %p3484_p6 = scmp.lt.s32.totalorder %s49_s11, %s49_s11 }
  0x2e   :  { %p3480_p5 = scmp.ne.s32.totalorder %s49_s11, %s3479_s1  ;;  %p3485_p7 = scmp.lt.s32.totalorder %s3479_s1, %s3479_s1 }
  0x30   :  { %p3486_p8 = por %p3485_p7, %p3484_p6 }
  0x32   :  { %p3487_p9 = pnand %p3486_p8, %p3480_p5 }
  0x34   :  { %3490 = shalt.err (!%p3487_p9)
}
  0x35   :  { %54 = dma.hbm_to_vmem [thread:$0]  %s4173_s3, 8192, %s49_s11, [#allocation8], %s3544_s15, %s3544_s15, %s3545_s16  }
  0x36   :  { %s3491_s27 = scalar_lea.hbm %s4175_s5, 2048 }
  0x37   :  { %p3492_p10 = scmp.ne.s32.totalorder %s4175_s5, %s3491_s27  ;;  %p3495_p11 = scmp.lt.u32.totalorder %s3491_s27, %s4175_s5 }
  0x39   :  { %p3497_p12 = pnand %p3495_p11, %p3492_p10 }
  0x3b   :  { %3500 = shalt.err (!%p3497_p12)
}
  0x3c   :  { %s3501_s12 = scalar_lea.vmem %s3633_s13, 2048  ;;  %p3506_p0 = scmp.lt.s32.totalorder %s3633_s13, %s3633_s13 }
  0x3d   :  { %p3502_p13 = scmp.ne.s32.totalorder %s3633_s13, %s3501_s12  ;;  %p3507_p1 = scmp.lt.s32.totalorder %s3501_s12, %s3501_s12 }
  0x3f   :  { %p3508_p2 = por %p3507_p1, %p3506_p0 }
  0x41   :  { %p3509_p3 = pnand %p3508_p2, %p3502_p13 }
  0x43   :  { %3512 = shalt.err (!%p3509_p3)
}
  0x44   :  { %68 = dma.hbm_to_vmem [thread:$0]  %s4175_s5, 2048, %s3633_s13, [#allocation11], %s3547_s2, %s3547_s2, %s3548_s28  }
  0x45   :  { %3535 = dma.done.wait [#allocation5], 2048  }
  0x46   :  { %3536 = vsyncadd [#allocation5], 4294965248 }
  0x47   :  { %3537 = dma.done.wait [#allocation8], 16384  }
  0x48   :  { %3538 = vsyncadd [#allocation8], 4294950912 }
  0x49   :  { %3539 = dma.done.wait [#allocation11], 2048  }
  0x4a   :  { %3540 = vsyncadd [#allocation11], 4294965248  ;;  %v3551_v0 = vmov 0   ;;  %v3552_v1 = vmov 0.0|0.0   ;;  %v85_v2 = vld [vmem:[%s4170_s0] sm:$0xff]  ;;  %v94_v3 = vld [vmem:[#allocation4] sm:$0xff] }
  0x4b   :  { %3372 = vset.pattern.permute.xlu0 %v3551_v0  ;;  %2733 = vmatprep.subr.bf16.mxu0 %v3552_v1  ;;  %v95_v4 = vld [vmem:[#allocation4 + $0x8] sm:$0xff]  ;;  %v96_v6 = vld [vmem:[#allocation4 + $0x10] sm:$0xff]  ;;  %v97_v7 = vld [vmem:[#allocation4 + $0x18] sm:$0xff]  ;;  %vm3553_vm0 = vmmov 0   ;;  %v3554_v8 = vmov 0.0  }
  0x4c   :  { %89 = vperm.xlu0 %3372, %v85_v2   ;;  %v2734_v5 = vpack.c.bf16 %v95_v4, %v94_v3  ;;  %2695 = vmatprep.mubr.msk.f32.mxu0 %vm3553_vm0, %v3554_v8  ;;  %v2737_v9 = vpack.c.bf16 %v97_v7, %v96_v6  ;;  %v98_v10 = vld [vmem:[#allocation4 + $0x20] sm:$0xff]  ;;  %v99_v11 = vld [vmem:[#allocation4 + $0x28] sm:$0xff]  ;;  %v100_v15 = vld [vmem:[#allocation4 + $0x30] sm:$0xff] }
  0x4d   :  { %330 = vmatprep.mubr.f32.mxu1 %v3554_v8  ;;  %v181_v12 = vld [vmem:[#allocation7 + $0x8] sm:$0xff]  ;;  %v2740_v14 = vpack.c.bf16 %v99_v11, %v98_v10  ;;  %v180_v17 = vld [vmem:[#allocation7] sm:$0xff]  ;;  %v101_v19 = vld [vmem:[#allocation4 + $0x38] sm:$0xff] }
  0x4e   :  { %2735 = vmatpush3.bf16.msra.mxu0 %v2734_v5  ;;  %v185_v13 = vld [vmem:[#allocation7 + $0x28] sm:$0xff]  ;;  %v184_v18 = vld [vmem:[#allocation7 + $0x20] sm:$0xff]  ;;  %v2743_v26 = vpack.c.bf16 %v101_v19, %v100_v15  ;;  %v104_v39 = vld [vmem:[#allocation4 + $0x50] sm:$0xff] }
  0x4f   :  { %2736 = vmatprep.subr.bf16.mxu0 %v3552_v1  ;;  %v2757_v16 = vpack.c.bf16 %v185_v13, %v181_v12  ;;  %v2759_v20 = vpack.c.bf16 %v184_v18, %v180_v17  ;;  %v189_v21 = vld [vmem:[#allocation7 + $0x48] sm:$0xff]  ;;  %v188_v24 = vld [vmem:[#allocation7 + $0x40] sm:$0xff]  ;;  %v105_v43 = vld [vmem:[#allocation4 + $0x58] sm:$0xff]  ;;  %v86_v17 = vlaneseq }
  0x50   :  { %v193_v22 = vld [vmem:[#allocation7 + $0x68] sm:$0xff]  ;;  %v192_v25 = vld [vmem:[#allocation7 + $0x60] sm:$0xff]  ;;  %v2749_v47 = vpack.c.bf16 %v105_v43, %v104_v39  ;;  %v108_v57 = vld [vmem:[#allocation4 + $0x70] sm:$0xff] }
  0x51   :  { %2758 = vmatprep.subr.bf16.mxu1 %v2757_v16  ;;  %v2761_v23 = vpack.c.bf16 %v193_v22, %v189_v21  ;;  %v102_v27 = vld [vmem:[#allocation4 + $0x40] sm:$0xff]  ;;  %v2763_v28 = vpack.c.bf16 %v192_v25, %v188_v24  ;;  %v197_v29 = vld [vmem:[#allocation7 + $0x88] sm:$0xff]  ;;  %v109_v61 = vld [vmem:[#allocation4 + $0x78] sm:$0xff] }
  0x52   :  { %2738 = vmatpush3.bf16.msra.mxu0 %v2737_v9  ;;  %2760 = vmatpush1.bf16.msra.mxu1 %v2759_v20  ;;  %v201_v30 = vld [vmem:[#allocation7 + $0xa8] sm:$0xff]  ;;  %v196_v33 = vld [vmem:[#allocation7 + $0x80] sm:$0xff]  ;;  %v183_v0 = vld [vmem:[#allocation7 + $0x18] sm:$0xff]  ;;  %v2755_v4 = vpack.c.bf16 %v109_v61, %v108_v57  ;;  %v87_v20 = vand.u32 127, %v86_v17 }
  0x53   :  { %2739 = vmatprep.subr.bf16.mxu0 %v3552_v1  ;;  %2762 = vmatprep.subr.bf16.mxu1 %v2761_v23  ;;  %v103_v31 = vld [vmem:[#allocation4 + $0x48] sm:$0xff]  ;;  %v2765_v32 = vpack.c.bf16 %v201_v30, %v197_v29  ;;  %v200_v34 = vld [vmem:[#allocation7 + $0xa0] sm:$0xff]  ;;  %v187_v2 = vld [vmem:[#allocation7 + $0x38] sm:$0xff]  ;;  %v3555_v30 = vmov 1.0  }
  0x54   :  { %v205_v35 = vld [vmem:[#allocation7 + $0xc8] sm:$0xff]  ;;  %v2767_v36 = vpack.c.bf16 %v200_v34, %v196_v33  ;;  %v2746_v38 = vpack.c.bf16 %v103_v31, %v102_v27  ;;  %v204_v41 = vld [vmem:[#allocation7 + $0xc0] sm:$0xff]  ;;  %v2789_v9 = vpack.c.bf16 %v187_v2, %v183_v0  ;;  %v182_v18 = vld [vmem:[#allocation7 + $0x10] sm:$0xff] }
  0x55   :  { %v209_v37 = vld [vmem:[#allocation7 + $0xe8] sm:$0xff]  ;;  %v208_v42 = vld [vmem:[#allocation7 + $0xe0] sm:$0xff]  ;;  %v186_v19 = vld [vmem:[#allocation7 + $0x30] sm:$0xff] }
  0x56   :  { %2741 = vmatpush3.bf16.msra.mxu0 %v2740_v14  ;;  %2764 = vmatpush1.bf16.msra.mxu1 %v2763_v28  ;;  %v2769_v40 = vpack.c.bf16 %v209_v37, %v205_v35  ;;  %v213_v44 = vld [vmem:[#allocation7 + $0x108] sm:$0xff]  ;;  %v2771_v46 = vpack.c.bf16 %v208_v42, %v204_v41  ;;  %v106_v48 = vld [vmem:[#allocation4 + $0x60] sm:$0xff]  ;;  %v191_v21 = vld [vmem:[#allocation7 + $0x58] sm:$0xff]  ;;  %v2791_v23 = vpack.c.bf16 %v186_v19, %v182_v18 }
  0x57   :  { %2742 = vmatprep.subr.bf16.mxu0 %v3552_v1  ;;  %2766 = vmatprep.subr.bf16.mxu1 %v2765_v32  ;;  %v217_v45 = vld [vmem:[#allocation7 + $0x128] sm:$0xff]  ;;  %v212_v50 = vld [vmem:[#allocation7 + $0x100] sm:$0xff]  ;;  %v195_v22 = vld [vmem:[#allocation7 + $0x78] sm:$0xff] }
  0x58   :  { %v2773_v49 = vpack.c.bf16 %v217_v45, %v213_v44  ;;  %v216_v51 = vld [vmem:[#allocation7 + $0x120] sm:$0xff]  ;;  %v107_v52 = vld [vmem:[#allocation4 + $0x68] sm:$0xff]  ;;  %v2793_v25 = vpack.c.bf16 %v195_v22, %v191_v21  ;;  %v194_v27 = vld [vmem:[#allocation7 + $0x70] sm:$0xff] }
  0x59   :  { %v221_v53 = vld [vmem:[#allocation7 + $0x148] sm:$0xff]  ;;  %v2775_v55 = vpack.c.bf16 %v216_v51, %v212_v50  ;;  %v2752_v56 = vpack.c.bf16 %v107_v52, %v106_v48  ;;  %v220_v59 = vld [vmem:[#allocation7 + $0x140] sm:$0xff]  ;;  %v199_v28 = vld [vmem:[#allocation7 + $0x98] sm:$0xff] }
  0x5a   :  { %2744 = vmatpush3.bf16.msra.mxu0 %v2743_v26  ;;  %2768 = vmatpush1.bf16.msra.mxu1 %v2767_v36  ;;  %v225_v54 = vld [vmem:[#allocation7 + $0x168] sm:$0xff]  ;;  %v224_v60 = vld [vmem:[#allocation7 + $0x160] sm:$0xff]  ;;  %v190_v26 = vld [vmem:[#allocation7 + $0x50] sm:$0xff] }
  0x5b   :  { %2745 = vmatprep.subr.bf16.mxu0 %v3552_v1  ;;  %2770 = vmatprep.subr.bf16.mxu1 %v2769_v40  ;;  %v2777_v58 = vpack.c.bf16 %v225_v54, %v221_v53  ;;  %v229_v62 = vld [vmem:[#allocation7 + $0x188] sm:$0xff]  ;;  %v2779_v3 = vpack.c.bf16 %v224_v60, %v220_v59  ;;  %v228_v6 = vld [vmem:[#allocation7 + $0x180] sm:$0xff]  ;;  %v203_v29 = vld [vmem:[#allocation7 + $0xb8] sm:$0xff]  ;;  %v2795_v31 = vpack.c.bf16 %v194_v27, %v190_v26 }
  0x5c   :  { %v233_v63 = vld [vmem:[#allocation7 + $0x1a8] sm:$0xff]  ;;  %v232_v7 = vld [vmem:[#allocation7 + $0x1a0] sm:$0xff]  ;;  %v2797_v32 = vpack.c.bf16 %v203_v29, %v199_v28  ;;  %v198_v33 = vld [vmem:[#allocation7 + $0x90] sm:$0xff] }
  0x5d   :  { %v2781_v5 = vpack.c.bf16 %v233_v63, %v229_v62  ;;  %v237_v10 = vld [vmem:[#allocation7 + $0x1c8] sm:$0xff]  ;;  %v2783_v12 = vpack.c.bf16 %v232_v7, %v228_v6  ;;  %v236_v14 = vld [vmem:[#allocation7 + $0x1c0] sm:$0xff]  ;;  %v202_v34 = vld [vmem:[#allocation7 + $0xb0] sm:$0xff] }
  0x5e   :  { %2747 = vmatpush3.bf16.msra.mxu0 %v2746_v38  ;;  %2772 = vmatpush1.bf16.msra.mxu1 %v2771_v46  ;;  %v241_v11 = vld [vmem:[#allocation7 + $0x1e8] sm:$0xff]  ;;  %v240_v15 = vld [vmem:[#allocation7 + $0x1e0] sm:$0xff]  ;;  %v207_v35 = vld [vmem:[#allocation7 + $0xd8] sm:$0xff]  ;;  %v2799_v37 = vpack.c.bf16 %v202_v34, %v198_v33 }
  0x5f   :  { %2748 = vmatprep.subr.bf16.mxu0 %v3552_v1  ;;  %2774 = vmatprep.subr.bf16.mxu1 %v2773_v49  ;;  %v2785_v13 = vpack.c.bf16 %v241_v11, %v237_v10  ;;  %v2787_v16 = vpack.c.bf16 %v240_v15, %v236_v14  ;;  %v211_v36 = vld [vmem:[#allocation7 + $0xf8] sm:$0xff]  ;;  %v206_v39 = vld [vmem:[#allocation7 + $0xd0] sm:$0xff]  ;;  %v413_v10 = vld [vmem:[#allocation9] sm:$0xff] }
  0x60   :  { %v2801_v38 = vpack.c.bf16 %v211_v36, %v207_v35  ;;  %v210_v40 = vld [vmem:[#allocation7 + $0xf0] sm:$0xff]  ;;  %v215_v41 = vld [vmem:[#allocation7 + $0x118] sm:$0xff]  ;;  %v417_v11 = vld [vmem:[#allocation9 + $0x20] sm:$0xff] }
  0x61   :  { %v219_v42 = vld [vmem:[#allocation7 + $0x138] sm:$0xff]  ;;  %v2803_v43 = vpack.c.bf16 %v210_v40, %v206_v39  ;;  %v214_v45 = vld [vmem:[#allocation7 + $0x110] sm:$0xff]  ;;  %v422_v14 = vld [vmem:[#allocation9 + $0x48] sm:$0xff]  ;;  %v3692_v19 = vpack.c.bf16 %v417_v11, %v413_v10 }
  0x62   :  { %2750 = vmatpush3.bf16.msra.mxu0 %v2749_v47  ;;  %2776 = vmatpush1.bf16.msra.mxu1 %v2775_v55  ;;  %v2805_v44 = vpack.c.bf16 %v219_v42, %v215_v41  ;;  %v218_v46 = vld [vmem:[#allocation7 + $0x130] sm:$0xff]  ;;  %v223_v47 = vld [vmem:[#allocation7 + $0x158] sm:$0xff]  ;;  %v426_v15 = vld [vmem:[#allocation9 + $0x68] sm:$0xff] }
  0x63   :  { %2751 = vmatprep.subr.bf16.mxu0 %v3552_v1  ;;  %2778 = vmatprep.subr.bf16.mxu1 %v2777_v58  ;;  %v227_v48 = vld [vmem:[#allocation7 + $0x178] sm:$0xff]  ;;  %v2807_v49 = vpack.c.bf16 %v218_v46, %v214_v45  ;;  %v222_v51 = vld [vmem:[#allocation7 + $0x150] sm:$0xff]  ;;  %v421_v21 = vld [vmem:[#allocation9 + $0x40] sm:$0xff] }
  0x64   :  { %v2809_v50 = vpack.c.bf16 %v227_v48, %v223_v47  ;;  %v226_v52 = vld [vmem:[#allocation7 + $0x170] sm:$0xff]  ;;  %v231_v53 = vld [vmem:[#allocation7 + $0x198] sm:$0xff]  ;;  %v425_v22 = vld [vmem:[#allocation9 + $0x60] sm:$0xff] }
  0x65   :  { %v235_v54 = vld [vmem:[#allocation7 + $0x1b8] sm:$0xff]  ;;  %v2811_v55 = vpack.c.bf16 %v226_v52, %v222_v51  ;;  %v230_v57 = vld [vmem:[#allocation7 + $0x190] sm:$0xff]  ;;  %v430_v27 = vld [vmem:[#allocation9 + $0x88] sm:$0xff]  ;;  %v3702_v33 = vpack.c.bf16 %v425_v22, %v421_v21 }
  0x66   :  { %2753 = vmatpush3.bf16.msra.mxu0 %v2752_v56  ;;  %2780 = vmatpush1.bf16.msra.mxu1 %v2779_v3  ;;  %v2813_v56 = vpack.c.bf16 %v235_v54, %v231_v53  ;;  %v234_v58 = vld [vmem:[#allocation7 + $0x1b0] sm:$0xff]  ;;  %v239_v59 = vld [vmem:[#allocation7 + $0x1d8] sm:$0xff]  ;;  %v414_v3 = vld [vmem:[#allocation9 + $0x8] sm:$0xff] }
  0x67   :  { %2754 = vmatprep.subr.bf16.mxu0 %v3552_v1  ;;  %2782 = vmatprep.subr.bf16.mxu1 %v2781_v5  ;;  %v243_v60 = vld [vmem:[#allocation7 + $0x1f8] sm:$0xff]  ;;  %v2815_v61 = vpack.c.bf16 %v234_v58, %v230_v57  ;;  %v238_v63 = vld [vmem:[#allocation7 + $0x1d0] sm:$0xff]  ;;  %v434_v29 = vld [vmem:[#allocation9 + $0xa8] sm:$0xff] }
  0x68   :  { %v2817_v62 = vpack.c.bf16 %v243_v60, %v239_v59  ;;  %v242_v0 = vld [vmem:[#allocation7 + $0x1f0] sm:$0xff]  ;;  %v416_v5 = vld [vmem:[#allocation9 + $0x18] sm:$0xff]  ;;  %v429_v35 = vld [vmem:[#allocation9 + $0x80] sm:$0xff] }
  0x69   :  { %v2819_v2 = vpack.c.bf16 %v242_v0, %v238_v63  ;;  %v420_v7 = vld [vmem:[#allocation9 + $0x38] sm:$0xff]  ;;  %v427_v26 = vld [vmem:[#allocation9 + $0x70] sm:$0xff]  ;;  %v433_v36 = vld [vmem:[#allocation9 + $0xa0] sm:$0xff] }
  0x6a   :  { %2756 = vmatpush3.bf16.msra.mxu0 %v2755_v4  ;;  %2784 = vmatpush1.bf16.msra.mxu1 %v2783_v12  ;;  %v418_v4 = vld [vmem:[#allocation9 + $0x28] sm:$0xff]  ;;  %v415_v12 = vld [vmem:[#allocation9 + $0x10] sm:$0xff]  ;;  %v428_v18 = vld [vmem:[#allocation9 + $0x78] sm:$0xff]  ;;  %v3716_v45 = vpack.c.bf16 %v433_v36, %v429_v35 }
  0x6b   :  { %2790 = vmatprep.subr.bf16.mxu0 %v2789_v9  ;;  %2786 = vmatprep.subr.bf16.mxu1 %v2785_v13  ;;  %v3686_v6 = vpack.c.bf16 %v418_v4, %v414_v3  ;;  %v3688_v9 = vpack.c.bf16 %v420_v7, %v416_v5  ;;  %v419_v13 = vld [vmem:[#allocation9 + $0x30] sm:$0xff]  ;;  %v438_v41 = vld [vmem:[#allocation9 + $0xc8] sm:$0xff]  ;;  %v437_v47 = vld [vmem:[#allocation9 + $0xc0] sm:$0xff] }
  0x6c   :  { %v431_v39 = vld [vmem:[#allocation9 + $0x90] sm:$0xff]  ;;  %v442_v42 = vld [vmem:[#allocation9 + $0xe8] sm:$0xff]  ;;  %v441_v48 = vld [vmem:[#allocation9 + $0xe0] sm:$0xff] }
  0x6d   :  { %v435_v40 = vld [vmem:[#allocation9 + $0xb0] sm:$0xff]  ;;  %v446_v53 = vld [vmem:[#allocation9 + $0x108] sm:$0xff]  ;;  %v3728_v57 = vpack.c.bf16 %v441_v48, %v437_v47  ;;  %v445_v59 = vld [vmem:[#allocation9 + $0x100] sm:$0xff] }
  0x6e   :  { %2788 = vmatpush1.bf16.msra.mxu1 %v2787_v16  ;;  %v424_v16 = vld [vmem:[#allocation9 + $0x58] sm:$0xff]  ;;  %v3718_v46 = vpack.c.bf16 %v435_v40, %v431_v39  ;;  %v439_v51 = vld [vmem:[#allocation9 + $0xd0] sm:$0xff]  ;;  %v450_v54 = vld [vmem:[#allocation9 + $0x128] sm:$0xff] }
  0x6f   :  { %2822 = vmatprep.subr.bf16.mxu1 %v3686_v6  ;;  %v443_v52 = vld [vmem:[#allocation9 + $0xf0] sm:$0xff]  ;;  %v449_v60 = vld [vmem:[#allocation9 + $0x120] sm:$0xff]  ;;  %v458_v3 = vld [vmem:[#allocation9 + $0x168] sm:$0xff] }
  0x70   :  { %v3730_v58 = vpack.c.bf16 %v443_v52, %v439_v51  ;;  %v447_v63 = vld [vmem:[#allocation9 + $0x110] sm:$0xff]  ;;  %v456_v4 = vld [vmem:[#allocation9 + $0x158] sm:$0xff]  ;;  %v3740_v7 = vpack.c.bf16 %v449_v60, %v445_v59  ;;  %v453_v11 = vld [vmem:[#allocation9 + $0x140] sm:$0xff] }
  0x71   :  { %v451_v0 = vld [vmem:[#allocation9 + $0x130] sm:$0xff]  ;;  %v460_v5 = vld [vmem:[#allocation9 + $0x178] sm:$0xff]  ;;  %v466_v21 = vld [vmem:[#allocation9 + $0x1a8] sm:$0xff] }
  0x72   :  { %v3742_v10 = vpack.c.bf16 %v451_v0, %v447_v63  ;;  %v464_v22 = vld [vmem:[#allocation9 + $0x198] sm:$0xff]  ;;  %v467_v35 = vld [vmem:[#allocation9 + $0x1b0] sm:$0xff]  ;;  %v470_v36 = vld [vmem:[#allocation9 + $0x1c8] sm:$0xff] }
  0x73   :  { %v474_v39 = vld [vmem:[#allocation9 + $0x1e8] sm:$0xff]  ;;  %v472_v40 = vld [vmem:[#allocation9 + $0x1d8] sm:$0xff]  ;;  %v473_v51 = vld [vmem:[#allocation9 + $0x1e0] sm:$0xff] }
  0x74   :  { %v3770_v47 = vpack.c.bf16 %v474_v39, %v470_v36  ;;  %v471_v52 = vld [vmem:[#allocation9 + $0x1d0] sm:$0xff] }
  0x75   :  { %v244_v63 = vld [vmem:[%s4174_s4] sm:$0xf] }
  0xcb   :  { %v90_v24 = vpop.permute.xlu0 %89 }
  0xcc   :  { %vm91_vm1 = vcmp.eq.s32.totalorder %v87_v20, %v90_v24  ;;  %v3694_v20 = vpack.c.bf16 %v419_v13, %v415_v12  ;;  %v3698_v24 = vpack.c.bf16 %v428_v18, %v424_v16  ;;  %v457_v12 = vld [vmem:[#allocation9 + $0x160] sm:$0xff]  ;;  %v459_v16 = vld [vmem:[#allocation9 + $0x170] sm:$0xff]  ;;  %v462_v18 = vld [vmem:[#allocation9 + $0x188] sm:$0xff] }
  0xcd   :  { %2696 = vmatmul.mubr.msk.f32.vlgmr.msra.gmra.mrb[0].mxu0 %vm91_vm1, %v3555_v30  ;;  %v432_v30 = vld [vmem:[#allocation9 + $0x98] sm:$0xff] }
  0xce   :  { %2792 = vmatpush1.bf16.msra.mxu0 %v2791_v23  ;;  %401 = vmatprep.mubr.f32.mxu0 %v3554_v8  ;;  %v3696_v23 = vpack.c.bf16 %v426_v15, %v422_v14  ;;  %v3748_v14 = vpack.c.bf16 %v460_v5, %v456_v4  ;;  %v455_v15 = vld [vmem:[#allocation9 + $0x150] sm:$0xff] }
  0xcf   :  { %2794 = vmatprep.subr.bf16.mxu0 %v2793_v25  ;;  %v423_v25 = vld [vmem:[#allocation9 + $0x50] sm:$0xff] }
  0xd0   :  { %v3704_v34 = vpack.c.bf16 %v427_v26, %v423_v25  ;;  %v468_v25 = vld [vmem:[#allocation9 + $0x1b8] sm:$0xff]  ;;  %v3752_v26 = vpack.c.bf16 %v457_v12, %v453_v11 }
  0xd2   :  { %2796 = vmatpush1.bf16.msra.mxu0 %v2795_v31  ;;  %v436_v31 = vld [vmem:[#allocation9 + $0xb8] sm:$0xff] }
  0xd3   :  { %2798 = vmatprep.subr.bf16.mxu0 %v2797_v32 }
  0xd6   :  { %2800 = vmatpush1.bf16.msra.mxu0 %v2799_v37  ;;  %v3708_v37 = vpack.c.bf16 %v434_v29, %v430_v27  ;;  %v3754_v27 = vpack.c.bf16 %v459_v16, %v455_v15  ;;  %v465_v29 = vld [vmem:[#allocation9 + $0x1a0] sm:$0xff] }
  0xd7   :  { %2802 = vmatprep.subr.bf16.mxu0 %v2801_v38  ;;  %v3710_v38 = vpack.c.bf16 %v436_v31, %v432_v30  ;;  %v3758_v30 = vpack.c.bf16 %v466_v21, %v462_v18  ;;  %v3760_v31 = vpack.c.bf16 %v468_v25, %v464_v22 }
  0xda   :  { %2804 = vmatpush1.bf16.msra.mxu0 %v2803_v43  ;;  %v440_v43 = vld [vmem:[#allocation9 + $0xd8] sm:$0xff] }
  0xdb   :  { %2806 = vmatprep.subr.bf16.mxu0 %v2805_v44  ;;  %v444_v44 = vld [vmem:[#allocation9 + $0xf8] sm:$0xff] }
  0xde   :  { %2808 = vmatpush1.bf16.msra.mxu0 %v2807_v49  ;;  %v3722_v49 = vpack.c.bf16 %v442_v42, %v438_v41  ;;  %v476_v41 = vld [vmem:[#allocation9 + $0x1f8] sm:$0xff] }
  0xdf   :  { %2810 = vmatprep.subr.bf16.mxu0 %v2809_v50  ;;  %v3724_v50 = vpack.c.bf16 %v444_v44, %v440_v43  ;;  %v469_v44 = vld [vmem:[#allocation9 + $0x1c0] sm:$0xff]  ;;  %v3772_v48 = vpack.c.bf16 %v476_v41, %v472_v40 }
  0xe2   :  { %2812 = vmatpush1.bf16.msra.mxu0 %v2811_v55  ;;  %v448_v55 = vld [vmem:[#allocation9 + $0x118] sm:$0xff] }
  0xe3   :  { %2814 = vmatprep.subr.bf16.mxu0 %v2813_v56  ;;  %v452_v56 = vld [vmem:[#allocation9 + $0x138] sm:$0xff] }
  0xe6   :  { %2816 = vmatpush1.bf16.msra.mxu0 %v2815_v61  ;;  %v3734_v61 = vpack.c.bf16 %v450_v54, %v446_v53  ;;  %v475_v53 = vld [vmem:[#allocation9 + $0x1f0] sm:$0xff]  ;;  %v3776_v54 = vpack.c.bf16 %v473_v51, %v469_v44 }
  0xe7   :  { %2818 = vmatprep.subr.bf16.mxu0 %v2817_v62  ;;  %v3736_v62 = vpack.c.bf16 %v452_v56, %v448_v55  ;;  %v3778_v55 = vpack.c.bf16 %v475_v53, %v471_v52  ;;  %v247_v56 = vshrl.u32 %v86_v17, 7 }
  0xe9   :  { %v248_v59 = vsub.s32 0, %v247_v56  ;;  %v256_v60 = vsub.s32 2, %v247_v56  ;;  %v252_v0 = vsub.s32 1, %v247_v56 }
  0xea   :  { %2820 = vmatpush1.bf16.msra.mxu0 %v2819_v2  ;;  %v454_v2 = vld [vmem:[#allocation9 + $0x148] sm:$0xff] }
  0xeb   :  { %2854 = vmatprep.subr.bf16.mxu0 %v3688_v9  ;;  %v3746_v13 = vpack.c.bf16 %v458_v3, %v454_v2  ;;  %v260_v2 = vsub.s32 3, %v247_v56  ;;  %v249_v3 = vrot.slane %v244_v63, %v248_v59  ;;  %v257_v4 = vrot.slane %v244_v63, %v256_v60 }
  0xec   :  { %v253_v5 = vrot.slane %v244_v63, %v252_v0 }
  0xed   :  { %v261_v11 = vrot.slane %v244_v63, %v260_v2 }
 0x1a0   :  { %v176_v28 = vpop.f32.mrb[0].mxu0 }
 0x1a1   :  { %v2697_v32 = vpop.f32.mrb[1].mxu0  ;;  %331 = vmatmul.mubr.f32.vlgmr.msra.gmra.mrb[0].mxu1 %v176_v28  ;;  %402 = vmatmul.mubr.f32.vlgmr.msra.gmra.mrb[2].mxu0 %v176_v28  ;;  %v461_v28 = vld [vmem:[#allocation9 + $0x180] sm:$0xff] }
 0x1a2   :  { %2824 = vmatpush1.bf16.msra.mxu1 %v3692_v19  ;;  %2856 = vmatpush1.bf16.msra.mxu0 %v3694_v20  ;;  %v463_v32 = vld [vmem:[#allocation9 + $0x190] sm:$0xff]  ;;  %v3764_v42 = vpack.c.bf16 %v465_v29, %v461_v28  ;;  %v3556_v28 = vmov 1966171168  }
 0x1a3   :  { %2826 = vmatprep.subr.bf16.mxu1 %v3696_v23  ;;  %2858 = vmatprep.subr.bf16.mxu0 %v3698_v24  ;;  %v3766_v43 = vpack.c.bf16 %v467_v35, %v463_v32  ;;  %v626_v29 = vunpack.c.l.s4 %v3556_v28 }
 0x1a4   :  { %541 = vmatprep.mubr.f32.mxu1 %v3554_v8  ;;  %612 = vmatprep.mubr.f32.mxu0 %v3554_v8 }
 0x1a5   :  { %v627_v32 = vunpack.c.0.s8 %v626_v29 }
 0x1a6   :  { %2828 = vmatpush1.bf16.msra.mxu1 %v3702_v33  ;;  %2860 = vmatpush1.bf16.msra.mxu0 %v3704_v34 }
 0x1a7   :  { %2830 = vmatprep.subr.bf16.mxu1 %v3708_v37  ;;  %2862 = vmatprep.subr.bf16.mxu0 %v3710_v38  ;;  %v3826_v35 = vsub.s32 %v627_v32, %v247_v56 }
 0x1aa   :  { %2832 = vmatpush1.bf16.msra.mxu1 %v3716_v45  ;;  %2864 = vmatpush1.bf16.msra.mxu0 %v3718_v46 }
 0x1ab   :  { %2834 = vmatprep.subr.bf16.mxu1 %v3722_v49  ;;  %2866 = vmatprep.subr.bf16.mxu0 %v3724_v50 }
 0x1ae   :  { %2836 = vmatpush1.bf16.msra.mxu1 %v3728_v57  ;;  %2868 = vmatpush1.bf16.msra.mxu0 %v3730_v58 }
 0x1af   :  { %2838 = vmatprep.subr.bf16.mxu1 %v3734_v61  ;;  %2870 = vmatprep.subr.bf16.mxu0 %v3736_v62 }
 0x1b2   :  { %2840 = vmatpush1.bf16.msra.mxu1 %v3740_v7  ;;  %2872 = vmatpush1.bf16.msra.mxu0 %v3742_v10 }
 0x1b3   :  { %2842 = vmatprep.subr.bf16.mxu1 %v3746_v13  ;;  %2874 = vmatprep.subr.bf16.mxu0 %v3748_v14 }
 0x1b6   :  { %2844 = vmatpush1.bf16.msra.mxu1 %v3752_v26  ;;  %2876 = vmatpush1.bf16.msra.mxu0 %v3754_v27 }
 0x1b7   :  { %2846 = vmatprep.subr.bf16.mxu1 %v3758_v30  ;;  %2878 = vmatprep.subr.bf16.mxu0 %v3760_v31 }
 0x1ba   :  { %2848 = vmatpush1.bf16.msra.mxu1 %v3764_v42  ;;  %2880 = vmatpush1.bf16.msra.mxu0 %v3766_v43 }
 0x1bb   :  { %2850 = vmatprep.subr.bf16.mxu1 %v3770_v47  ;;  %2882 = vmatprep.subr.bf16.mxu0 %v3772_v48 }
 0x1be   :  { %2852 = vmatpush1.bf16.msra.mxu1 %v3776_v54  ;;  %2884 = vmatpush1.bf16.msra.mxu0 %v3778_v55 }
 0x1bf   :  { %2886 = vmatprep.subr.bf16.mxu1 %v3686_v6  ;;  %2918 = vmatprep.subr.bf16.mxu0 %v3688_v9 }
 0x1c1   :  { %542 = vmatmul.mubr.f32.vlgmr.msra.gmra.mrb[2].mxu1 %v3554_v8  ;;  %613 = vmatmul.mubr.f32.vlgmr.msra.gmra.mrb[4].mxu0 %v3554_v8 }
 0x1c2   :  { %2888 = vmatpush1.bf16.msra.mxu1 %v3692_v19  ;;  %2920 = vmatpush1.bf16.msra.mxu0 %v3694_v20 }
 0x1c3   :  { %2890 = vmatprep.subr.bf16.mxu1 %v3696_v23  ;;  %2922 = vmatprep.subr.bf16.mxu0 %v3698_v24 }
 0x1c4   :  { %800 = vmatprep.mubr.f32.mxu1 %v3554_v8  ;;  %871 = vmatprep.mubr.f32.mxu0 %v3554_v8 }
 0x1c6   :  { %2892 = vmatpush1.bf16.msra.mxu1 %v3702_v33  ;;  %2924 = vmatpush1.bf16.msra.mxu0 %v3704_v34 }
 0x1c7   :  { %2894 = vmatprep.subr.bf16.mxu1 %v3708_v37  ;;  %2926 = vmatprep.subr.bf16.mxu0 %v3710_v38 }
 0x1ca   :  { %2896 = vmatpush1.bf16.msra.mxu1 %v3716_v45  ;;  %2928 = vmatpush1.bf16.msra.mxu0 %v3718_v46 }
 0x1cb   :  { %2898 = vmatprep.subr.bf16.mxu1 %v3722_v49  ;;  %2930 = vmatprep.subr.bf16.mxu0 %v3724_v50 }
 0x1ce   :  { %2900 = vmatpush1.bf16.msra.mxu1 %v3728_v57  ;;  %2932 = vmatpush1.bf16.msra.mxu0 %v3730_v58 }
 0x1cf   :  { %2902 = vmatprep.subr.bf16.mxu1 %v3734_v61  ;;  %2934 = vmatprep.subr.bf16.mxu0 %v3736_v62 }
 0x1d2   :  { %2904 = vmatpush1.bf16.msra.mxu1 %v3740_v7  ;;  %2936 = vmatpush1.bf16.msra.mxu0 %v3742_v10 }
 0x1d3   :  { %2906 = vmatprep.subr.bf16.mxu1 %v3746_v13  ;;  %2938 = vmatprep.subr.bf16.mxu0 %v3748_v14 }
 0x1d6   :  { %2908 = vmatpush1.bf16.msra.mxu1 %v3752_v26  ;;  %2940 = vmatpush1.bf16.msra.mxu0 %v3754_v27 }
 0x1d7   :  { %2910 = vmatprep.subr.bf16.mxu1 %v3758_v30  ;;  %2942 = vmatprep.subr.bf16.mxu0 %v3760_v31 }
 0x1da   :  { %2912 = vmatpush1.bf16.msra.mxu1 %v3764_v42  ;;  %2944 = vmatpush1.bf16.msra.mxu0 %v3766_v43 }
 0x1db   :  { %2914 = vmatprep.subr.bf16.mxu1 %v3770_v47  ;;  %2946 = vmatprep.subr.bf16.mxu0 %v3772_v48 }
 0x1de   :  { %2916 = vmatpush1.bf16.msra.mxu1 %v3776_v54  ;;  %2948 = vmatpush1.bf16.msra.mxu0 %v3778_v55 }
 0x1df   :  { %2950 = vmatprep.subr.bf16.mxu1 %v3686_v6  ;;  %2982 = vmatprep.subr.bf16.mxu0 %v3688_v9 }
 0x274   :  { %v332_v12 = vpop.f32.mrb[0].mxu1  ;;  %v403_v15 = vpop.f32.mrb[2].mxu0 }
 0x275   :  { %v333_v16 = vadd.f32 %v332_v12, %v249_v3  ;;  %v404_v18 = vadd.f32 %v403_v15, %v257_v4  ;;  %v334_v21 = vpop.f32.mrb[1].mxu1  ;;  %v405_v22 = vpop.f32.mrb[3].mxu0 }
 0x276   :  { %v335_v25 = vadd.f32 %v334_v21, %v253_v5  ;;  %v406_v17 = vadd.f32 %v405_v22, %v261_v11 }
 0x277   :  { %408 = vst [vmem:[#allocation2] sm:$0xff] %v333_v16  ;;  %410 = vst [vmem:[#allocation2 + $0x10] sm:$0xff] %v404_v18 }
 0x278   :  { %409 = vst [vmem:[#allocation2 + $0x8] sm:$0xff] %v335_v25  ;;  %411 = vst [vmem:[#allocation2 + $0x18] sm:$0xff] %v406_v17 }
 0x27f   :  { %v412_v63 = vld [vmem:[#allocation2] ss:$8 sm:$0xf] }
 0x294   :  { %v543_v36 = vpop.f32.mrb[2].mxu1  ;;  %v614_v39 = vpop.f32.mrb[4].mxu0 }
 0x295   :  { %v545_v40 = vpop.f32.mrb[3].mxu1  ;;  %v616_v41 = vpop.f32.mrb[5].mxu0 }
 0x296   :  { %v623_v44 = vcombine.low %v543_v36, %v545_v40  ;;  %v624_v51 = vcombine.low %v614_v39, %v616_v41 }
 0x298   :  { %v631_v52 = vrot.slane %v623_v44, %v3826_v35  ;;  %v638_v53 = vrot.slane %v624_v51, %v3826_v35 }
 0x29a   :  { %v639_v59 = vcombine.low %v631_v52, %v638_v53  ;;  %v671_v53 = vld [vmem:[#allocation2 + $0x1] ss:$8 sm:$0xf] }
 0x29c   :  { %v646_v60 = vrot.slane %v639_v59, %v3826_v35 }
 0x29e   :  { %v648_v0 = vadd.f32 %v646_v60, %v412_v63 }
 0x2a0   :  { %v2612_v2 = vmul.f32 -1.442695, %v648_v0 }
 0x2a2   :  { %3373 = vpow2.f32 %v2612_v2 }
 0x2ac   :  { %v3374_v3 = vpop.eup %3373 }
 0x2ad   :  { %v652_v56 = vadd.f32 1.0, %v3374_v3 }
 0x2af   :  { %3375 = vrcp.f32 %v652_v56 }
 0x2b9   :  { %v3376_v4 = vpop.eup %3375 }
 0x2ba   :  { %v656_v5 = vrot.slane %v3376_v4, 2  ;;  %v660_v12 = vrot.slane %v3376_v4, 1  ;;  %v666_v22 = vrot.slane %v3376_v4, 3 }
 0x2bc   :  { %v658_v11 = vmul.f32 2.0, %v656_v5  ;;  %v662_v16 = vmul.f32 0.0, %v660_v12 }
 0x2be   :  { %v2613_v15 = vadd.f32 -1.0, %v658_v11 }
 0x2c0   :  { %v663_v18 = vmul.f32 %v3376_v4, %v2613_v15 }
 0x2c2   :  { %v3831_v21 = vadd.f32 %v663_v18, %v662_v16  ;;  %v1456_v18 = vld [vmem:[#allocation9 + $0x38] sm:$0xff] }
 0x2c4   :  { %3377 = vtanh.f32 %v3831_v21 }
 0x2ce   :  { %v3378_v25 = vpop.eup %3377 }
 0x2cf   :  { %v668_v17 = vmul.f32 %v3378_v25, %v666_v22  ;;  %v1453_v22 = vld [vmem:[#allocation9 + $0x20] sm:$0xff] }
 0x2d1   :  { %669 = vst [vmem:[#allocation3] sm:$0x1] %v668_v17  ;;  %801 = vmatmul.mubr.f32.vlgmr.msra.gmra.mrb[4].mxu1 %v668_v17  ;;  %872 = vmatmul.mubr.f32.vlgmr.msra.gmra.mrb[6].mxu0 %v668_v17 }
 0x2d2   :  { %2952 = vmatpush1.bf16.msra.mxu1 %v3692_v19  ;;  %2984 = vmatpush1.bf16.msra.mxu0 %v3694_v20 }
 0x2d3   :  { %2954 = vmatprep.subr.bf16.mxu1 %v3696_v23  ;;  %2986 = vmatprep.subr.bf16.mxu0 %v3698_v24 }
 0x2d4   :  { %1059 = vmatprep.mubr.f32.mxu1 %v3554_v8  ;;  %1130 = vmatprep.mubr.f32.mxu0 %v3554_v8 }
 0x2d6   :  { %2956 = vmatpush1.bf16.msra.mxu1 %v3702_v33  ;;  %2988 = vmatpush1.bf16.msra.mxu0 %v3704_v34 }
 0x2d7   :  { %2958 = vmatprep.subr.bf16.mxu1 %v3708_v37  ;;  %2990 = vmatprep.subr.bf16.mxu0 %v3710_v38 }
 0x2da   :  { %2960 = vmatpush1.bf16.msra.mxu1 %v3716_v45  ;;  %2992 = vmatpush1.bf16.msra.mxu0 %v3718_v46 }
 0x2db   :  { %2962 = vmatprep.subr.bf16.mxu1 %v3722_v49  ;;  %2994 = vmatprep.subr.bf16.mxu0 %v3724_v50 }
 0x2de   :  { %2964 = vmatpush1.bf16.msra.mxu1 %v3728_v57  ;;  %2996 = vmatpush1.bf16.msra.mxu0 %v3730_v58 }
 0x2df   :  { %2966 = vmatprep.subr.bf16.mxu1 %v3734_v61  ;;  %2998 = vmatprep.subr.bf16.mxu0 %v3736_v62 }
 0x2e2   :  { %2968 = vmatpush1.bf16.msra.mxu1 %v3740_v7  ;;  %3000 = vmatpush1.bf16.msra.mxu0 %v3742_v10 }
 0x2e3   :  { %2970 = vmatprep.subr.bf16.mxu1 %v3746_v13  ;;  %3002 = vmatprep.subr.bf16.mxu0 %v3748_v14 }
 0x2e6   :  { %2972 = vmatpush1.bf16.msra.mxu1 %v3752_v26  ;;  %3004 = vmatpush1.bf16.msra.mxu0 %v3754_v27 }
 0x2e7   :  { %2974 = vmatprep.subr.bf16.mxu1 %v3758_v30  ;;  %3006 = vmatprep.subr.bf16.mxu0 %v3760_v31 }
 0x2ea   :  { %2976 = vmatpush1.bf16.msra.mxu1 %v3764_v42  ;;  %3008 = vmatpush1.bf16.msra.mxu0 %v3766_v43 }
 0x2eb   :  { %2978 = vmatprep.subr.bf16.mxu1 %v3770_v47  ;;  %3010 = vmatprep.subr.bf16.mxu0 %v3772_v48 }
 0x2ee   :  { %2980 = vmatpush1.bf16.msra.mxu1 %v3776_v54  ;;  %3012 = vmatpush1.bf16.msra.mxu0 %v3778_v55 }
 0x2ef   :  { %3014 = vmatprep.subr.bf16.mxu1 %v3686_v6  ;;  %3046 = vmatprep.subr.bf16.mxu0 %v3688_v9 }
 0x3a4   :  { %v802_v28 = vpop.f32.mrb[4].mxu1  ;;  %v873_v29 = vpop.f32.mrb[6].mxu0 }
 0x3a5   :  { %v804_v32 = vpop.f32.mrb[5].mxu1  ;;  %v875_v36 = vpop.f32.mrb[7].mxu0 }
 0x3a6   :  { %v882_v39 = vcombine.low %v802_v28, %v804_v32  ;;  %v883_v40 = vcombine.low %v873_v29, %v875_v36  ;;  %v1451_v28 = vld [vmem:[#allocation9 + $0x10] sm:$0xff]  ;;  %v1458_v32 = vld [vmem:[#allocation9 + $0x48] sm:$0xff] }
 0x3a7   :  { %v1455_v29 = vld [vmem:[#allocation9 + $0x30] sm:$0xff] }
 0x3a8   :  { %v890_v41 = vrot.slane %v882_v39, %v3826_v35  ;;  %v897_v44 = vrot.slane %v883_v40, %v3826_v35  ;;  %v3919_v36 = vpack.c.bf16 %v1455_v29, %v1451_v28  ;;  %v1462_v39 = vld [vmem:[#allocation9 + $0x68] sm:$0xff]  ;;  %v1460_v40 = vld [vmem:[#allocation9 + $0x58] sm:$0xff]  ;;  %v1493_v28 = vld [vmem:[#allocation9 + $0x160] sm:$0xff] }
 0x3a9   :  { %v1491_v29 = vld [vmem:[#allocation9 + $0x150] sm:$0xff] }
 0x3aa   :  { %v898_v51 = vcombine.low %v890_v41, %v897_v44  ;;  %v1464_v41 = vld [vmem:[#allocation9 + $0x78] sm:$0xff]  ;;  %v3923_v44 = vpack.c.bf16 %v1462_v39, %v1458_v32  ;;  %v1495_v39 = vld [vmem:[#allocation9 + $0x170] sm:$0xff] }
 0x3ac   :  { %v905_v52 = vrot.slane %v898_v51, %v3826_v35  ;;  %v3925_v51 = vpack.c.bf16 %v1464_v41, %v1460_v40  ;;  %v1498_v40 = vld [vmem:[#allocation9 + $0x188] sm:$0xff] }
 0x3ad   :  { %v1502_v41 = vld [vmem:[#allocation9 + $0x1a8] sm:$0xff] }
 0x3ae   :  { %v907_v59 = vadd.f32 %v905_v52, %v671_v53  ;;  %v1457_v52 = vld [vmem:[#allocation9 + $0x40] sm:$0xff] }
 0x3af   :  { %v1461_v53 = vld [vmem:[#allocation9 + $0x60] sm:$0xff] }
 0x3b0   :  { %v2614_v60 = vmul.f32 -1.442695, %v907_v59  ;;  %v1459_v59 = vld [vmem:[#allocation9 + $0x50] sm:$0xff] }
 0x3b2   :  { %3379 = vpow2.f32 %v2614_v60  ;;  %v3928_v60 = vpack.c.bf16 %v1461_v53, %v1457_v52  ;;  %v1500_v52 = vld [vmem:[#allocation9 + $0x198] sm:$0xff] }
 0x3b3   :  { %v1504_v53 = vld [vmem:[#allocation9 + $0x1b8] sm:$0xff] }
 0x3bc   :  { %v3380_v6 = vpop.eup %3379 }
 0x3bd   :  { %v911_v63 = vadd.f32 1.0, %v3380_v6  ;;  %v1463_v6 = vld [vmem:[#allocation9 + $0x70] sm:$0xff] }
 0x3bf   :  { %3381 = vrcp.f32 %v911_v63  ;;  %v1466_v63 = vld [vmem:[#allocation9 + $0x88] sm:$0xff] }
 0x3c9   :  { %v3382_v9 = vpop.eup %3381 }
 0x3ca   :  { %v915_v0 = vrot.slane %v3382_v9, 2  ;;  %v919_v3 = vrot.slane %v3382_v9, 1  ;;  %v925_v12 = vrot.slane %v3382_v9, 3 }
 0x3cc   :  { %v917_v2 = vmul.f32 2.0, %v915_v0  ;;  %v921_v4 = vmul.f32 %v919_v3, %v3831_v21  ;;  %v1449_v21 = vld [vmem:[#allocation9] sm:$0xff]  ;;  %v3932_v0 = vpack.c.bf16 %v1463_v6, %v1459_v59  ;;  %v1468_v3 = vld [vmem:[#allocation9 + $0x98] sm:$0xff]  ;;  %v3979_v6 = vpack.c.bf16 %v1495_v39, %v1491_v29 }
 0x3cd   :  { %v3916_v17 = vpack.c.bf16 %v1453_v22, %v1449_v21  ;;  %v1489_v22 = vld [vmem:[#allocation9 + $0x140] sm:$0xff] }
 0x3ce   :  { %v2615_v56 = vadd.f32 -1.0, %v917_v2  ;;  %v3975_v59 = vpack.c.bf16 %v1493_v28, %v1489_v22  ;;  %v1189_v29 = vld [vmem:[#allocation2 + $0x3] ss:$8 sm:$0xf] }
 0x3d0   :  { %v922_v5 = vmul.f32 %v3382_v9, %v2615_v56  ;;  %v1470_v9 = vld [vmem:[#allocation9 + $0xa8] sm:$0xff]  ;;  %v1472_v56 = vld [vmem:[#allocation9 + $0xb8] sm:$0xff] }
 0x3d1   :  { %v3934_v2 = vpack.c.bf16 %v1470_v9, %v1466_v63  ;;  %v3981_v63 = vpack.c.bf16 %v1502_v41, %v1498_v40  ;;  %v1497_v9 = vld [vmem:[#allocation9 + $0x180] sm:$0xff] }
 0x3d2   :  { %v923_v11 = vadd.f32 %v922_v5, %v921_v4  ;;  %v1465_v4 = vld [vmem:[#allocation9 + $0x80] sm:$0xff]  ;;  %v3936_v5 = vpack.c.bf16 %v1472_v56, %v1468_v3  ;;  %v1499_v56 = vld [vmem:[#allocation9 + $0x190] sm:$0xff] }
 0x3d3   :  { %v1501_v3 = vld [vmem:[#allocation9 + $0x1a0] sm:$0xff] }
 0x3d4   :  { %3383 = vtanh.f32 %v923_v11 }
 0x3de   :  { %v3384_v15 = vpop.eup %3383 }
 0x3df   :  { %v927_v16 = vmul.f32 %v3384_v15, %v925_v12  ;;  %v1467_v12 = vld [vmem:[#allocation9 + $0x90] sm:$0xff] }
 0x3e0   :  { %v1471_v15 = vld [vmem:[#allocation9 + $0xb0] sm:$0xff] }
 0x3e1   :  { %928 = vst [vmem:[#allocation3 + $0x1] sm:$0x1] %v927_v16  ;;  %1060 = vmatmul.mubr.f32.vlgmr.msra.gmra.mrb[6].mxu1 %v927_v16  ;;  %1131 = vmatmul.mubr.f32.vlgmr.msra.gmra.mrb[8].mxu0 %v927_v16 }
 0x3e2   :  { %3016 = vmatpush1.bf16.msra.mxu1 %v3692_v19  ;;  %3048 = vmatpush1.bf16.msra.mxu0 %v3694_v20 }
 0x3e3   :  { %3018 = vmatprep.subr.bf16.mxu1 %v3696_v23  ;;  %3050 = vmatprep.subr.bf16.mxu0 %v3698_v24 }
 0x3e4   :  { %1318 = vmatprep.mubr.f32.mxu1 %v3554_v8  ;;  %1389 = vmatprep.mubr.f32.mxu0 %v3554_v8 }
 0x3e6   :  { %3020 = vmatpush1.bf16.msra.mxu1 %v3702_v33  ;;  %3052 = vmatpush1.bf16.msra.mxu0 %v3704_v34 }
 0x3e7   :  { %3022 = vmatprep.subr.bf16.mxu1 %v3708_v37  ;;  %3054 = vmatprep.subr.bf16.mxu0 %v3710_v38 }
 0x3ea   :  { %3024 = vmatpush1.bf16.msra.mxu1 %v3716_v45  ;;  %3056 = vmatpush1.bf16.msra.mxu0 %v3718_v46 }
 0x3eb   :  { %3026 = vmatprep.subr.bf16.mxu1 %v3722_v49  ;;  %3058 = vmatprep.subr.bf16.mxu0 %v3724_v50  ;;  %v930_v49 = vld [vmem:[#allocation2 + $0x2] ss:$8 sm:$0xf] }
 0x3ee   :  { %3028 = vmatpush1.bf16.msra.mxu1 %v3728_v57  ;;  %3060 = vmatpush1.bf16.msra.mxu0 %v3730_v58 }
 0x3ef   :  { %3030 = vmatprep.subr.bf16.mxu1 %v3734_v61  ;;  %3062 = vmatprep.subr.bf16.mxu0 %v3736_v62 }
 0x3f2   :  { %3032 = vmatpush1.bf16.msra.mxu1 %v3740_v7  ;;  %3064 = vmatpush1.bf16.msra.mxu0 %v3742_v10 }
 0x3f3   :  { %3034 = vmatprep.subr.bf16.mxu1 %v3746_v13  ;;  %3066 = vmatprep.subr.bf16.mxu0 %v3748_v14 }
 0x3f6   :  { %3036 = vmatpush1.bf16.msra.mxu1 %v3752_v26  ;;  %3068 = vmatpush1.bf16.msra.mxu0 %v3754_v27 }
 0x3f7   :  { %3038 = vmatprep.subr.bf16.mxu1 %v3758_v30  ;;  %3070 = vmatprep.subr.bf16.mxu0 %v3760_v31 }
 0x3fa   :  { %3040 = vmatpush1.bf16.msra.mxu1 %v3764_v42  ;;  %3072 = vmatpush1.bf16.msra.mxu0 %v3766_v43 }
 0x3fb   :  { %3042 = vmatprep.subr.bf16.mxu1 %v3770_v47  ;;  %3074 = vmatprep.subr.bf16.mxu0 %v3772_v48  ;;  %v1450_v47 = vld [vmem:[#allocation9 + $0x8] sm:$0xff] }
 0x3fc   :  { %v1454_v48 = vld [vmem:[#allocation9 + $0x28] sm:$0xff] }
 0x3fe   :  { %3044 = vmatpush1.bf16.msra.mxu1 %v3776_v54  ;;  %3076 = vmatpush1.bf16.msra.mxu0 %v3778_v55  ;;  %v1452_v54 = vld [vmem:[#allocation9 + $0x18] sm:$0xff]  ;;  %v3912_v55 = vpack.c.bf16 %v1454_v48, %v1450_v47 }
 0x3ff   :  { %v3914_v25 = vpack.c.bf16 %v1456_v18, %v1452_v54  ;;  %v1492_v47 = vld [vmem:[#allocation9 + $0x158] sm:$0xff] }
 0x400   :  { %3078 = vmatprep.subr.bf16.mxu1 %v3912_v55  ;;  %v1496_v48 = vld [vmem:[#allocation9 + $0x178] sm:$0xff] }
 0x401   :  { %3110 = vmatprep.subr.bf16.mxu0 %v3914_v25  ;;  %v3972_v32 = vpack.c.bf16 %v1496_v48, %v1492_v47 }
 0x4b4   :  { %v1061_v19 = vpop.f32.mrb[6].mxu1  ;;  %v1132_v20 = vpop.f32.mrb[8].mxu0 }
 0x4b5   :  { %v1063_v23 = vpop.f32.mrb[7].mxu1  ;;  %v1134_v24 = vpop.f32.mrb[9].mxu0 }
 0x4b6   :  { %v1141_v33 = vcombine.low %v1061_v19, %v1063_v23  ;;  %v1142_v34 = vcombine.low %v1132_v20, %v1134_v24  ;;  %v1474_v19 = vld [vmem:[#allocation9 + $0xc8] sm:$0xff]  ;;  %v1476_v23 = vld [vmem:[#allocation9 + $0xd8] sm:$0xff]  ;;  %v3943_v24 = vpack.c.bf16 %v1471_v15, %v1467_v12 }
 0x4b7   :  { %v1478_v20 = vld [vmem:[#allocation9 + $0xe8] sm:$0xff] }
 0x4b8   :  { %v1149_v37 = vrot.slane %v1141_v33, %v3826_v35  ;;  %v1156_v38 = vrot.slane %v1142_v34, %v3826_v35  ;;  %v3945_v33 = vpack.c.bf16 %v1478_v20, %v1474_v19  ;;  %v1480_v34 = vld [vmem:[#allocation9 + $0xf8] sm:$0xff]  ;;  %v1506_v12 = vld [vmem:[#allocation9 + $0x1c8] sm:$0xff] }
 0x4b9   :  { %v1510_v15 = vld [vmem:[#allocation9 + $0x1e8] sm:$0xff]  ;;  %v1508_v19 = vld [vmem:[#allocation9 + $0x1d8] sm:$0xff] }
 0x4ba   :  { %v1157_v45 = vcombine.low %v1149_v37, %v1156_v38  ;;  %v1473_v37 = vld [vmem:[#allocation9 + $0xc0] sm:$0xff]  ;;  %v1512_v20 = vld [vmem:[#allocation9 + $0x1f8] sm:$0xff] }
 0x4bb   :  { %v1477_v38 = vld [vmem:[#allocation9 + $0xe0] sm:$0xff] }
 0x4bc   :  { %v1164_v46 = vrot.slane %v1157_v45, %v3826_v35  ;;  %v3948_v45 = vpack.c.bf16 %v1480_v34, %v1476_v23  ;;  %v3987_v23 = vpack.c.bf16 %v1501_v3, %v1497_v9 }
 0x4be   :  { %v1166_v50 = vadd.f32 %v1164_v46, %v930_v49  ;;  %v1475_v46 = vld [vmem:[#allocation9 + $0xd0] sm:$0xff] }
 0x4bf   :  { %v1479_v49 = vld [vmem:[#allocation9 + $0xf0] sm:$0xff] }
 0x4c0   :  { %v2616_v57 = vmul.f32 -1.442695, %v1166_v50  ;;  %v1482_v50 = vld [vmem:[#allocation9 + $0x108] sm:$0xff] }
 0x4c2   :  { %3385 = vpow2.f32 %v2616_v57  ;;  %v1486_v57 = vld [vmem:[#allocation9 + $0x128] sm:$0xff] }
 0x4cc   :  { %v3386_v58 = vpop.eup %3385 }
 0x4cd   :  { %v1170_v61 = vadd.f32 1.0, %v3386_v58  ;;  %v1484_v58 = vld [vmem:[#allocation9 + $0x118] sm:$0xff] }
 0x4cf   :  { %3387 = vrcp.f32 %v1170_v61  ;;  %v1488_v61 = vld [vmem:[#allocation9 + $0x138] sm:$0xff] }
 0x4d9   :  { %v3388_v62 = vpop.eup %3387 }
 0x4da   :  { %v1174_v7 = vrot.slane %v3388_v62, 2  ;;  %v1178_v13 = vrot.slane %v3388_v62, 1  ;;  %v1184_v31 = vrot.slane %v3388_v62, 3 }
 0x4dc   :  { %v1176_v10 = vmul.f32 2.0, %v1174_v7  ;;  %v1180_v26 = vmul.f32 %v1178_v13, %v923_v11  ;;  %v1469_v11 = vld [vmem:[#allocation9 + $0xa0] sm:$0xff]  ;;  %v3955_v7 = vpack.c.bf16 %v1479_v49, %v1475_v46  ;;  %v3996_v49 = vpack.c.bf16 %v1512_v20, %v1508_v19 }
 0x4dd   :  { %v3939_v16 = vpack.c.bf16 %v1469_v11, %v1465_v4  ;;  %v1481_v13 = vld [vmem:[#allocation9 + $0x100] sm:$0xff]  ;;  %v3984_v4 = vpack.c.bf16 %v1504_v53, %v1500_v52  ;;  %v1503_v11 = vld [vmem:[#allocation9 + $0x1b0] sm:$0xff] }
 0x4de   :  { %v2617_v14 = vadd.f32 -1.0, %v1176_v10  ;;  %v3957_v10 = vpack.c.bf16 %v1486_v57, %v1482_v50  ;;  %v3991_v34 = vpack.c.bf16 %v1503_v11, %v1499_v56  ;;  %v1509_v46 = vld [vmem:[#allocation9 + $0x1e0] sm:$0xff]  ;;  %v1507_v50 = vld [vmem:[#allocation9 + $0x1d0] sm:$0xff] }
 0x4df   :  { %v1511_v57 = vld [vmem:[#allocation9 + $0x1f0] sm:$0xff] }
 0x4e0   :  { %v1181_v27 = vmul.f32 %v3388_v62, %v2617_v14  ;;  %v3951_v62 = vpack.c.bf16 %v1477_v38, %v1473_v37  ;;  %v1485_v14 = vld [vmem:[#allocation9 + $0x120] sm:$0xff]  ;;  %v3993_v37 = vpack.c.bf16 %v1510_v15, %v1506_v12 }
 0x4e1   :  { %v3963_v54 = vpack.c.bf16 %v1485_v14, %v1481_v13  ;;  %v1505_v38 = vld [vmem:[#allocation9 + $0x1c0] sm:$0xff] }
 0x4e2   :  { %v3907_v30 = vadd.f32 %v1181_v27, %v1180_v26  ;;  %v1483_v26 = vld [vmem:[#allocation9 + $0x110] sm:$0xff]  ;;  %v3960_v27 = vpack.c.bf16 %v1488_v61, %v1484_v58  ;;  %v3999_v58 = vpack.c.bf16 %v1509_v46, %v1505_v38  ;;  %v4003_v61 = vpack.c.bf16 %v1511_v57, %v1507_v50 }
 0x4e4   :  { %3389 = vtanh.f32 %v3907_v30 }
 0x4ee   :  { %v3390_v42 = vpop.eup %3389 }
 0x4ef   :  { %v1186_v43 = vmul.f32 %v3390_v42, %v1184_v31  ;;  %v1487_v31 = vld [vmem:[#allocation9 + $0x130] sm:$0xff]  ;;  %v1490_v42 = vld [vmem:[#allocation9 + $0x148] sm:$0xff] }
 0x4f0   :  { %v3967_v18 = vpack.c.bf16 %v1487_v31, %v1483_v26 }
 0x4f1   :  { %1187 = vst [vmem:[#allocation3 + $0x2] sm:$0x1] %v1186_v43  ;;  %1319 = vmatmul.mubr.f32.vlgmr.msra.gmra.mrb[8].mxu1 %v1186_v43  ;;  %1390 = vmatmul.mubr.f32.vlgmr.msra.gmra.mrb[10].mxu0 %v1186_v43  ;;  %v1494_v43 = vld [vmem:[#allocation9 + $0x168] sm:$0xff] }
 0x4f2   :  { %1577 = vmatprep.mubr.f32.mxu1 %v3554_v8  ;;  %1648 = vmatprep.mubr.f32.mxu0 %v3554_v8  ;;  %v3969_v21 = vpack.c.bf16 %v1494_v43, %v1490_v42 }
 0x4f3   :  { %3080 = vmatpush1.bf16.msra.mxu1 %v3916_v17  ;;  %3112 = vmatpush1.bf16.msra.mxu0 %v3919_v36 }
 0x4f4   :  { %3082 = vmatprep.subr.bf16.mxu1 %v3923_v44  ;;  %3114 = vmatprep.subr.bf16.mxu0 %v3925_v51 }
 0x4f7   :  { %3084 = vmatpush1.bf16.msra.mxu1 %v3928_v60  ;;  %3116 = vmatpush1.bf16.msra.mxu0 %v3932_v0 }
 0x4f8   :  { %3086 = vmatprep.subr.bf16.mxu1 %v3934_v2  ;;  %3118 = vmatprep.subr.bf16.mxu0 %v3936_v5 }
 0x4fb   :  { %3088 = vmatpush1.bf16.msra.mxu1 %v3939_v16  ;;  %3120 = vmatpush1.bf16.msra.mxu0 %v3943_v24 }
 0x4fc   :  { %3090 = vmatprep.subr.bf16.mxu1 %v3945_v33  ;;  %3122 = vmatprep.subr.bf16.mxu0 %v3948_v45 }
 0x4ff   :  { %3092 = vmatpush1.bf16.msra.mxu1 %v3951_v62  ;;  %3124 = vmatpush1.bf16.msra.mxu0 %v3955_v7 }
 0x500   :  { %3094 = vmatprep.subr.bf16.mxu1 %v3957_v10  ;;  %3126 = vmatprep.subr.bf16.mxu0 %v3960_v27 }
 0x503   :  { %3096 = vmatpush1.bf16.msra.mxu1 %v3963_v54  ;;  %3128 = vmatpush1.bf16.msra.mxu0 %v3967_v18 }
 0x504   :  { %3098 = vmatprep.subr.bf16.mxu1 %v3969_v21  ;;  %3130 = vmatprep.subr.bf16.mxu0 %v3972_v32 }
 0x507   :  { %3100 = vmatpush1.bf16.msra.mxu1 %v3975_v59  ;;  %3132 = vmatpush1.bf16.msra.mxu0 %v3979_v6 }
 0x508   :  { %3102 = vmatprep.subr.bf16.mxu1 %v3981_v63  ;;  %3134 = vmatprep.subr.bf16.mxu0 %v3984_v4 }
 0x50b   :  { %3104 = vmatpush1.bf16.msra.mxu1 %v3987_v23  ;;  %3136 = vmatpush1.bf16.msra.mxu0 %v3991_v34 }
 0x50c   :  { %3106 = vmatprep.subr.bf16.mxu1 %v3993_v37  ;;  %3138 = vmatprep.subr.bf16.mxu0 %v3996_v49 }
 0x50f   :  { %3108 = vmatpush1.bf16.msra.mxu1 %v3999_v58  ;;  %3140 = vmatpush1.bf16.msra.mxu0 %v4003_v61 }
 0x510   :  { %3142 = vmatprep.subr.bf16.mxu1 %v3912_v55  ;;  %3174 = vmatprep.subr.bf16.mxu0 %v3914_v25 }
 0x5c4   :  { %v1320_v13 = vpop.f32.mrb[8].mxu1  ;;  %v1391_v14 = vpop.f32.mrb[10].mxu0 }
 0x5c5   :  { %v1322_v26 = vpop.f32.mrb[9].mxu1  ;;  %v1393_v31 = vpop.f32.mrb[11].mxu0 }
 0x5c6   :  { %v1400_v42 = vcombine.low %v1320_v13, %v1322_v26  ;;  %v1401_v43 = vcombine.low %v1391_v14, %v1393_v31 }
 0x5c8   :  { %v1408_v47 = vrot.slane %v1400_v42, %v3826_v35  ;;  %v1415_v48 = vrot.slane %v1401_v43, %v3826_v35 }
 0x5ca   :  { %v1416_v22 = vcombine.low %v1408_v47, %v1415_v48  ;;  %v1448_v48 = vld [vmem:[#allocation2 + $0x4] ss:$8 sm:$0xf] }
 0x5cc   :  { %v1423_v28 = vrot.slane %v1416_v22, %v3826_v35 }
 0x5ce   :  { %v1425_v39 = vadd.f32 %v1423_v28, %v1189_v29 }
 0x5d0   :  { %v2618_v40 = vmul.f32 -1.442695, %v1425_v39 }
 0x5d2   :  { %3391 = vpow2.f32 %v2618_v40 }
 0x5dc   :  { %v3392_v41 = vpop.eup %3391 }
 0x5dd   :  { %v1429_v52 = vadd.f32 1.0, %v3392_v41 }
 0x5df   :  { %3393 = vrcp.f32 %v1429_v52 }
 0x5e9   :  { %v3394_v53 = vpop.eup %3393 }
 0x5ea   :  { %v1433_v9 = vrot.slane %v3394_v53, 2  ;;  %v1437_v56 = vrot.slane %v3394_v53, 1  ;;  %v1443_v20 = vrot.slane %v3394_v53, 3 }
 0x5ec   :  { %v1435_v3 = vmul.f32 2.0, %v1433_v9  ;;  %v1439_v12 = vmul.f32 %v1437_v56, %v3907_v30 }
 0x5ee   :  { %v2619_v11 = vadd.f32 -1.0, %v1435_v3 }
 0x5f0   :  { %v1440_v15 = vmul.f32 %v3394_v53, %v2619_v11 }
 0x5f2   :  { %v4014_v19 = vadd.f32 %v1440_v15, %v1439_v12 }
 0x5f4   :  { %3395 = vtanh.f32 %v4014_v19 }
 0x5fe   :  { %v3396_v38 = vpop.eup %3395 }
 0x5ff   :  { %v1445_v46 = vmul.f32 %v3396_v38, %v1443_v20 }
 0x601   :  { %1446 = vst [vmem:[#allocation3 + $0x3] sm:$0x1] %v1445_v46  ;;  %1578 = vmatmul.mubr.f32.vlgmr.msra.gmra.mrb[10].mxu1 %v1445_v46  ;;  %1649 = vmatmul.mubr.f32.vlgmr.msra.gmra.mrb[12].mxu0 %v1445_v46 }
 0x602   :  { %3144 = vmatpush1.bf16.msra.mxu1 %v3916_v17  ;;  %3176 = vmatpush1.bf16.msra.mxu0 %v3919_v36 }
 0x603   :  { %3146 = vmatprep.subr.bf16.mxu1 %v3923_v44  ;;  %3178 = vmatprep.subr.bf16.mxu0 %v3925_v51 }
 0x604   :  { %1836 = vmatprep.mubr.f32.mxu1 %v3554_v8  ;;  %1907 = vmatprep.mubr.f32.mxu0 %v3554_v8 }
 0x606   :  { %3148 = vmatpush1.bf16.msra.mxu1 %v3928_v60  ;;  %3180 = vmatpush1.bf16.msra.mxu0 %v3932_v0 }
 0x607   :  { %3150 = vmatprep.subr.bf16.mxu1 %v3934_v2  ;;  %3182 = vmatprep.subr.bf16.mxu0 %v3936_v5 }
 0x60a   :  { %3152 = vmatpush1.bf16.msra.mxu1 %v3939_v16  ;;  %3184 = vmatpush1.bf16.msra.mxu0 %v3943_v24 }
 0x60b   :  { %3154 = vmatprep.subr.bf16.mxu1 %v3945_v33  ;;  %3186 = vmatprep.subr.bf16.mxu0 %v3948_v45 }
 0x60e   :  { %3156 = vmatpush1.bf16.msra.mxu1 %v3951_v62  ;;  %3188 = vmatpush1.bf16.msra.mxu0 %v3955_v7 }
 0x60f   :  { %3158 = vmatprep.subr.bf16.mxu1 %v3957_v10  ;;  %3190 = vmatprep.subr.bf16.mxu0 %v3960_v27 }
 0x612   :  { %3160 = vmatpush1.bf16.msra.mxu1 %v3963_v54  ;;  %3192 = vmatpush1.bf16.msra.mxu0 %v3967_v18 }
 0x613   :  { %3162 = vmatprep.subr.bf16.mxu1 %v3969_v21  ;;  %3194 = vmatprep.subr.bf16.mxu0 %v3972_v32 }
 0x616   :  { %3164 = vmatpush1.bf16.msra.mxu1 %v3975_v59  ;;  %3196 = vmatpush1.bf16.msra.mxu0 %v3979_v6 }
 0x617   :  { %3166 = vmatprep.subr.bf16.mxu1 %v3981_v63  ;;  %3198 = vmatprep.subr.bf16.mxu0 %v3984_v4 }
 0x61a   :  { %3168 = vmatpush1.bf16.msra.mxu1 %v3987_v23  ;;  %3200 = vmatpush1.bf16.msra.mxu0 %v3991_v34 }
 0x61b   :  { %3170 = vmatprep.subr.bf16.mxu1 %v3993_v37  ;;  %3202 = vmatprep.subr.bf16.mxu0 %v3996_v49 }
 0x61e   :  { %3172 = vmatpush1.bf16.msra.mxu1 %v3999_v58  ;;  %3204 = vmatpush1.bf16.msra.mxu0 %v4003_v61 }
 0x61f   :  { %3206 = vmatprep.subr.bf16.mxu1 %v3912_v55  ;;  %3238 = vmatprep.subr.bf16.mxu0 %v3914_v25 }
 0x6d4   :  { %v1579_v30 = vpop.f32.mrb[10].mxu1  ;;  %v1650_v50 = vpop.f32.mrb[12].mxu0 }
 0x6d5   :  { %v1581_v57 = vpop.f32.mrb[11].mxu1  ;;  %v1652_v13 = vpop.f32.mrb[13].mxu0 }
 0x6d6   :  { %v1659_v14 = vcombine.low %v1579_v30, %v1581_v57  ;;  %v1660_v26 = vcombine.low %v1650_v50, %v1652_v13 }
 0x6d8   :  { %v1667_v31 = vrot.slane %v1659_v14, %v3826_v35  ;;  %v1674_v42 = vrot.slane %v1660_v26, %v3826_v35 }
 0x6da   :  { %v1675_v43 = vcombine.low %v1667_v31, %v1674_v42  ;;  %v1707_v42 = vld [vmem:[#allocation2 + $0x5] ss:$8 sm:$0xf] }
 0x6dc   :  { %v1682_v47 = vrot.slane %v1675_v43, %v3826_v35 }
 0x6de   :  { %v1684_v22 = vadd.f32 %v1682_v47, %v1448_v48 }
 0x6e0   :  { %v2620_v28 = vmul.f32 -1.442695, %v1684_v22 }
 0x6e2   :  { %3397 = vpow2.f32 %v2620_v28 }
 0x6ec   :  { %v3398_v29 = vpop.eup %3397 }
 0x6ed   :  { %v1688_v39 = vadd.f32 1.0, %v3398_v29 }
 0x6ef   :  { %3399 = vrcp.f32 %v1688_v39 }
 0x6f9   :  { %v3400_v40 = vpop.eup %3399 }
 0x6fa   :  { %v1692_v41 = vrot.slane %v3400_v40, 2  ;;  %v1696_v53 = vrot.slane %v3400_v40, 1  ;;  %v1702_v12 = vrot.slane %v3400_v40, 3 }
 0x6fc   :  { %v1694_v52 = vmul.f32 2.0, %v1692_v41  ;;  %v1698_v3 = vmul.f32 %v1696_v53, %v4014_v19 }
 0x6fe   :  { %v2621_v9 = vadd.f32 -1.0, %v1694_v52 }
 0x700   :  { %v1699_v56 = vmul.f32 %v3400_v40, %v2621_v9 }
 0x702   :  { %v4055_v11 = vadd.f32 %v1699_v56, %v1698_v3  ;;  %v2487_v56 = vld [vmem:[#allocation10 + $0x18] sm:$0xff] }
 0x704   :  { %3401 = vtanh.f32 %v4055_v11 }
 0x70e   :  { %v3402_v15 = vpop.eup %3401 }
 0x70f   :  { %v1704_v20 = vmul.f32 %v3402_v15, %v1702_v12  ;;  %v2488_v12 = vld [vmem:[#allocation10 + $0x20] sm:$0xff]  ;;  %v2489_v15 = vld [vmem:[#allocation10 + $0x28] sm:$0xff] }
 0x711   :  { %1705 = vst [vmem:[#allocation3 + $0x4] sm:$0x1] %v1704_v20  ;;  %1837 = vmatmul.mubr.f32.vlgmr.msra.gmra.mrb[12].mxu1 %v1704_v20  ;;  %1908 = vmatmul.mubr.f32.vlgmr.msra.gmra.mrb[14].mxu0 %v1704_v20  ;;  %v3340_v20 = vpack.c.bf16 %v2489_v15, %v2488_v12 }
 0x712   :  { %3208 = vmatpush1.bf16.msra.mxu1 %v3916_v17  ;;  %3240 = vmatpush1.bf16.msra.mxu0 %v3919_v36 }
 0x713   :  { %3210 = vmatprep.subr.bf16.mxu1 %v3923_v44  ;;  %3242 = vmatprep.subr.bf16.mxu0 %v3925_v51 }
 0x714   :  { %2095 = vmatprep.mubr.f32.mxu1 %v3554_v8  ;;  %2166 = vmatprep.mubr.f32.mxu0 %v3554_v8 }
 0x716   :  { %3212 = vmatpush1.bf16.msra.mxu1 %v3928_v60  ;;  %3244 = vmatpush1.bf16.msra.mxu0 %v3932_v0 }
 0x717   :  { %3214 = vmatprep.subr.bf16.mxu1 %v3934_v2  ;;  %3246 = vmatprep.subr.bf16.mxu0 %v3936_v5 }
 0x71a   :  { %3216 = vmatpush1.bf16.msra.mxu1 %v3939_v16  ;;  %3248 = vmatpush1.bf16.msra.mxu0 %v3943_v24 }
 0x71b   :  { %3218 = vmatprep.subr.bf16.mxu1 %v3945_v33  ;;  %3250 = vmatprep.subr.bf16.mxu0 %v3948_v45 }
 0x71e   :  { %3220 = vmatpush1.bf16.msra.mxu1 %v3951_v62  ;;  %3252 = vmatpush1.bf16.msra.mxu0 %v3955_v7 }
 0x71f   :  { %3222 = vmatprep.subr.bf16.mxu1 %v3957_v10  ;;  %3254 = vmatprep.subr.bf16.mxu0 %v3960_v27 }
 0x722   :  { %3224 = vmatpush1.bf16.msra.mxu1 %v3963_v54  ;;  %3256 = vmatpush1.bf16.msra.mxu0 %v3967_v18 }
 0x723   :  { %3226 = vmatprep.subr.bf16.mxu1 %v3969_v21  ;;  %3258 = vmatprep.subr.bf16.mxu0 %v3972_v32 }
 0x726   :  { %3228 = vmatpush1.bf16.msra.mxu1 %v3975_v59  ;;  %3260 = vmatpush1.bf16.msra.mxu0 %v3979_v6 }
 0x727   :  { %3230 = vmatprep.subr.bf16.mxu1 %v3981_v63  ;;  %3262 = vmatprep.subr.bf16.mxu0 %v3984_v4 }
 0x72a   :  { %3232 = vmatpush1.bf16.msra.mxu1 %v3987_v23  ;;  %3264 = vmatpush1.bf16.msra.mxu0 %v3991_v34 }
 0x72b   :  { %3234 = vmatprep.subr.bf16.mxu1 %v3993_v37  ;;  %3266 = vmatprep.subr.bf16.mxu0 %v3996_v49 }
 0x72e   :  { %3236 = vmatpush1.bf16.msra.mxu1 %v3999_v58  ;;  %3268 = vmatpush1.bf16.msra.mxu0 %v4003_v61 }
 0x72f   :  { %3270 = vmatprep.subr.bf16.mxu1 %v3912_v55  ;;  %3302 = vmatprep.subr.bf16.mxu0 %v3914_v25 }
 0x7e4   :  { %v1838_v19 = vpop.f32.mrb[12].mxu1  ;;  %v1909_v38 = vpop.f32.mrb[14].mxu0 }
 0x7e5   :  { %v1840_v46 = vpop.f32.mrb[13].mxu1  ;;  %v1911_v30 = vpop.f32.mrb[15].mxu0 }
 0x7e6   :  { %v1918_v50 = vcombine.low %v1838_v19, %v1840_v46  ;;  %v1919_v57 = vcombine.low %v1909_v38, %v1911_v30  ;;  %v2490_v19 = vld [vmem:[#allocation10 + $0x30] sm:$0xff]  ;;  %v2491_v38 = vld [vmem:[#allocation10 + $0x38] sm:$0xff]  ;;  %v2493_v30 = vld [vmem:[#allocation10 + $0x48] sm:$0xff] }
 0x7e7   :  { %v3343_v46 = vpack.c.bf16 %v2491_v38, %v2490_v19 }
 0x7e8   :  { %v1926_v13 = vrot.slane %v1918_v50, %v3826_v35  ;;  %v1933_v14 = vrot.slane %v1919_v57, %v3826_v35  ;;  %v2494_v57 = vld [vmem:[#allocation10 + $0x50] sm:$0xff] }
 0x7ea   :  { %v1934_v26 = vcombine.low %v1926_v13, %v1933_v14  ;;  %v2495_v13 = vld [vmem:[#allocation10 + $0x58] sm:$0xff] }
 0x7eb   :  { %v3349_v14 = vpack.c.bf16 %v2495_v13, %v2494_v57 }
 0x7ec   :  { %v1941_v31 = vrot.slane %v1934_v26, %v3826_v35  ;;  %v2496_v26 = vld [vmem:[#allocation10 + $0x60] sm:$0xff] }
 0x7ee   :  { %v1943_v43 = vadd.f32 %v1941_v31, %v1707_v42  ;;  %v2497_v31 = vld [vmem:[#allocation10 + $0x68] sm:$0xff] }
 0x7ef   :  { %v3352_v42 = vpack.c.bf16 %v2497_v31, %v2496_v26 }
 0x7f0   :  { %v2622_v47 = vmul.f32 -1.442695, %v1943_v43  ;;  %v2498_v43 = vld [vmem:[#allocation10 + $0x70] sm:$0xff] }
 0x7f2   :  { %3403 = vpow2.f32 %v2622_v47  ;;  %v2499_v47 = vld [vmem:[#allocation10 + $0x78] sm:$0xff] }
 0x7fc   :  { %v3404_v55 = vpop.eup %3403 }
 0x7fd   :  { %v1947_v48 = vadd.f32 1.0, %v3404_v55  ;;  %v3355_v55 = vpack.c.bf16 %v2499_v47, %v2498_v43 }
 0x7ff   :  { %3405 = vrcp.f32 %v1947_v48 }
 0x809   :  { %v3406_v25 = vpop.eup %3405 }
 0x80a   :  { %v1951_v22 = vrot.slane %v3406_v25, 2  ;;  %v1955_v29 = vrot.slane %v3406_v25, 1  ;;  %v1961_v53 = vrot.slane %v3406_v25, 3 }
 0x80c   :  { %v1953_v28 = vmul.f32 2.0, %v1951_v22  ;;  %v1957_v40 = vmul.f32 %v1955_v29, %v4055_v11 }
 0x80e   :  { %v2623_v39 = vadd.f32 -1.0, %v1953_v28 }
 0x810   :  { %v1958_v41 = vmul.f32 %v3406_v25, %v2623_v39 }
 0x812   :  { %v4096_v52 = vadd.f32 %v1958_v41, %v1957_v40 }
 0x814   :  { %3407 = vtanh.f32 %v4096_v52 }
 0x81e   :  { %v3408_v9 = vpop.eup %3407 }
 0x81f   :  { %v1963_v3 = vmul.f32 %v3408_v9, %v1961_v53  ;;  %v2225_v9 = vld [vmem:[#allocation2 + $0x7] ss:$8 sm:$0xf] }
 0x821   :  { %1964 = vst [vmem:[#allocation3 + $0x5] sm:$0x1] %v1963_v3  ;;  %2096 = vmatmul.mubr.f32.vlgmr.msra.gmra.mrb[14].mxu1 %v1963_v3  ;;  %2167 = vmatmul.mubr.f32.vlgmr.msra.gmra.mrb[16].mxu0 %v1963_v3 }
 0x822   :  { %3272 = vmatpush1.bf16.msra.mxu1 %v3916_v17  ;;  %3304 = vmatpush1.bf16.msra.mxu0 %v3919_v36 }
 0x823   :  { %3274 = vmatprep.subr.bf16.mxu1 %v3923_v44  ;;  %3306 = vmatprep.subr.bf16.mxu0 %v3925_v51 }
 0x824   :  { %2354 = vmatprep.mubr.f32.mxu1 %v3554_v8  ;;  %2425 = vmatprep.mubr.f32.mxu0 %v3554_v8 }
 0x826   :  { %3276 = vmatpush1.bf16.msra.mxu1 %v3928_v60  ;;  %3308 = vmatpush1.bf16.msra.mxu0 %v3932_v0 }
 0x827   :  { %3278 = vmatprep.subr.bf16.mxu1 %v3934_v2  ;;  %3310 = vmatprep.subr.bf16.mxu0 %v3936_v5 }
 0x82a   :  { %3280 = vmatpush1.bf16.msra.mxu1 %v3939_v16  ;;  %3312 = vmatpush1.bf16.msra.mxu0 %v3943_v24 }
 0x82b   :  { %3282 = vmatprep.subr.bf16.mxu1 %v3945_v33  ;;  %3314 = vmatprep.subr.bf16.mxu0 %v3948_v45  ;;  %v1966_v33 = vld [vmem:[#allocation2 + $0x6] ss:$8 sm:$0xf] }
 0x82e   :  { %3284 = vmatpush1.bf16.msra.mxu1 %v3951_v62  ;;  %3316 = vmatpush1.bf16.msra.mxu0 %v3955_v7 }
 0x82f   :  { %3286 = vmatprep.subr.bf16.mxu1 %v3957_v10  ;;  %3318 = vmatprep.subr.bf16.mxu0 %v3960_v27 }
 0x832   :  { %3288 = vmatpush1.bf16.msra.mxu1 %v3963_v54  ;;  %3320 = vmatpush1.bf16.msra.mxu0 %v3967_v18 }
 0x833   :  { %3290 = vmatprep.subr.bf16.mxu1 %v3969_v21  ;;  %3322 = vmatprep.subr.bf16.mxu0 %v3972_v32 }
 0x836   :  { %3292 = vmatpush1.bf16.msra.mxu1 %v3975_v59  ;;  %3324 = vmatpush1.bf16.msra.mxu0 %v3979_v6 }
 0x837   :  { %3294 = vmatprep.subr.bf16.mxu1 %v3981_v63  ;;  %3326 = vmatprep.subr.bf16.mxu0 %v3984_v4 }
 0x83a   :  { %3296 = vmatpush1.bf16.msra.mxu1 %v3987_v23  ;;  %3328 = vmatpush1.bf16.msra.mxu0 %v3991_v34 }
 0x83b   :  { %3298 = vmatprep.subr.bf16.mxu1 %v3993_v37  ;;  %3330 = vmatprep.subr.bf16.mxu0 %v3996_v49  ;;  %v2484_v37 = vld [vmem:[#allocation10] sm:$0xff]  ;;  %v2485_v49 = vld [vmem:[#allocation10 + $0x8] sm:$0xff] }
 0x83e   :  { %3300 = vmatpush1.bf16.msra.mxu1 %v3999_v58  ;;  %3332 = vmatpush1.bf16.msra.mxu0 %v4003_v61  ;;  %v2486_v58 = vld [vmem:[#allocation10 + $0x10] sm:$0xff]  ;;  %v3334_v61 = vpack.c.bf16 %v2485_v49, %v2484_v37 }
 0x83f   :  { %3333 = vmatprep.subr.bf16.mxu1 %v3552_v1  ;;  %v3337_v11 = vpack.c.bf16 %v2487_v56, %v2486_v58 }
 0x8f4   :  { %v2097_v17 = vpop.f32.mrb[14].mxu1  ;;  %v2168_v36 = vpop.f32.mrb[16].mxu0 }
 0x8f5   :  { %v2099_v44 = vpop.f32.mrb[15].mxu1  ;;  %v2170_v51 = vpop.f32.mrb[17].mxu0 }
 0x8f6   :  { %v2177_v60 = vcombine.low %v2097_v17, %v2099_v44  ;;  %v2178_v0 = vcombine.low %v2168_v36, %v2170_v51 }
 0x8f8   :  { %v2185_v2 = vrot.slane %v2177_v60, %v3826_v35  ;;  %v2192_v5 = vrot.slane %v2178_v0, %v3826_v35 }
 0x8fa   :  { %v2193_v16 = vcombine.low %v2185_v2, %v2192_v5 }
 0x8fc   :  { %v2200_v24 = vrot.slane %v2193_v16, %v3826_v35 }
 0x8fe   :  { %v2202_v45 = vadd.f32 %v2200_v24, %v1966_v33 }
 0x900   :  { %v2624_v62 = vmul.f32 -1.442695, %v2202_v45 }
 0x902   :  { %3409 = vpow2.f32 %v2624_v62 }
 0x90c   :  { %v3410_v7 = vpop.eup %3409 }
 0x90d   :  { %v2206_v10 = vadd.f32 1.0, %v3410_v7  ;;  %v2628_v7 = vld [vmem:[%s4176_s6] ss:$0 sm:$0xff]  ;;  %s3557_s6 = smov [#allocation12]  }
 0x90e   :  { %s2599_s14 = sshll.u32 %s3557_s6, 4  ;;  %s2600_s14 = int_to_ptr.vmem [resolvable:$true] %s2599_s14 }
 0x90f   :  { %3411 = vrcp.f32 %v2206_v10  ;;  %p3518_p5 = scmp.lt.s32.totalorder %s2600_s14, %s2600_s14 }
 0x919   :  { %v3412_v27 = vpop.eup %3411 }
 0x91a   :  { %v2210_v54 = vrot.slane %v3412_v27, 2  ;;  %v2214_v21 = vrot.slane %v3412_v27, 1  ;;  %v2220_v4 = vrot.slane %v3412_v27, 3 }
 0x91c   :  { %v2212_v18 = vmul.f32 2.0, %v2210_v54  ;;  %v2216_v59 = vmul.f32 %v2214_v21, %v4096_v52 }
 0x91e   :  { %v2625_v32 = vadd.f32 -1.0, %v2212_v18 }
 0x920   :  { %v2217_v6 = vmul.f32 %v3412_v27, %v2625_v32  ;;  %v2577_v27 = vld [vmem:[%s4177_s7] sm:$0xff]  ;;  %s3513_s7 = scalar_lea.vmem %s2600_s14, 128 }
 0x921   :  { %p3514_p4 = scmp.ne.s32.totalorder %s2600_s14, %s3513_s7  ;;  %p3519_p6 = scmp.lt.s32.totalorder %s3513_s7, %s3513_s7 }
 0x922   :  { %v4136_v63 = vadd.f32 %v2217_v6, %v2216_v59 }
 0x923   :  { %p3520_p7 = por %p3519_p6, %p3518_p5 }
 0x924   :  { %3413 = vtanh.f32 %v4136_v63 }
 0x925   :  { %p3521_p8 = pnand %p3520_p7, %p3514_p4 }
 0x92e   :  { %v3414_v23 = vpop.eup %3413 }
 0x92f   :  { %v2222_v34 = vmul.f32 %v3414_v23, %v2220_v4 }
 0x931   :  { %2223 = vst [vmem:[#allocation3 + $0x6] sm:$0x1] %v2222_v34  ;;  %2355 = vmatmul.mubr.f32.vlgmr.msra.gmra.mrb[16].mxu1 %v2222_v34  ;;  %2426 = vmatmul.mubr.f32.vlgmr.msra.gmra.mrb[18].mxu0 %v2222_v34 }
 0x932   :  { %2730 = vmatprep.mubr.msk.f32.mxu1 %vm3553_vm0, %v3554_v8  ;;  %3335 = vmatpush3.bf16.msra.mxu1 %v3334_v61  ;;  %v2492_v8 = vld [vmem:[#allocation10 + $0x40] sm:$0xff] }
 0x933   :  { %3336 = vmatprep.subr.bf16.mxu1 %v3552_v1  ;;  %v3346_v50 = vpack.c.bf16 %v2493_v30, %v2492_v8 }
 0x936   :  { %3338 = vmatpush3.bf16.msra.mxu1 %v3337_v11 }
 0x937   :  { %3339 = vmatprep.subr.bf16.mxu1 %v3552_v1 }
 0x93a   :  { %3341 = vmatpush3.bf16.msra.mxu1 %v3340_v20 }
 0x93b   :  { %3342 = vmatprep.subr.bf16.mxu1 %v3552_v1 }
 0x93e   :  { %3344 = vmatpush3.bf16.msra.mxu1 %v3343_v46 }
 0x93f   :  { %3345 = vmatprep.subr.bf16.mxu1 %v3552_v1 }
 0x942   :  { %3347 = vmatpush3.bf16.msra.mxu1 %v3346_v50 }
 0x943   :  { %3348 = vmatprep.subr.bf16.mxu1 %v3552_v1 }
 0x946   :  { %3350 = vmatpush3.bf16.msra.mxu1 %v3349_v14 }
 0x947   :  { %3351 = vmatprep.subr.bf16.mxu1 %v3552_v1 }
 0x94a   :  { %3353 = vmatpush3.bf16.msra.mxu1 %v3352_v42 }
 0x94b   :  { %3354 = vmatprep.subr.bf16.mxu1 %v3552_v1 }
 0x94e   :  { %3356 = vmatpush3.bf16.msra.mxu1 %v3355_v55 }
 0xa04   :  { %v2356_v48 = vpop.f32.mrb[16].mxu1  ;;  %v2427_v25 = vpop.f32.mrb[18].mxu0 }
 0xa05   :  { %v2358_v22 = vpop.f32.mrb[17].mxu1  ;;  %v2429_v28 = vpop.f32.mrb[19].mxu0 }
 0xa06   :  { %v2436_v29 = vcombine.low %v2356_v48, %v2358_v22  ;;  %v2437_v39 = vcombine.low %v2427_v25, %v2429_v28 }
 0xa08   :  { %v2444_v40 = vrot.slane %v2436_v29, %v3826_v35  ;;  %v2451_v41 = vrot.slane %v2437_v39, %v3826_v35 }
 0xa0a   :  { %v2452_v52 = vcombine.low %v2444_v40, %v2451_v41 }
 0xa0c   :  { %v2459_v53 = vrot.slane %v2452_v52, %v3826_v35 }
 0xa0e   :  { %v2461_v3 = vadd.f32 %v2459_v53, %v2225_v9 }
 0xa10   :  { %v2626_v17 = vmul.f32 -1.442695, %v2461_v3 }
 0xa12   :  { %3415 = vpow2.f32 %v2626_v17 }
 0xa1c   :  { %v3416_v36 = vpop.eup %3415 }
 0xa1d   :  { %v2465_v1 = vadd.f32 1.0, %v3416_v36 }
 0xa1f   :  { %3417 = vrcp.f32 %v2465_v1 }
 0xa29   :  { %v3418_v44 = vpop.eup %3417 }
 0xa2a   :  { %v2469_v51 = vrot.slane %v3418_v44, 2  ;;  %v2473_v0 = vrot.slane %v3418_v44, 1  ;;  %v2479_v33 = vrot.slane %v3418_v44, 3 }
 0xa2c   :  { %v2471_v60 = vmul.f32 2.0, %v2469_v51  ;;  %v2475_v5 = vmul.f32 %v2473_v0, %v4136_v63 }
 0xa2e   :  { %v2627_v2 = vadd.f32 -1.0, %v2471_v60 }
 0xa30   :  { %v2476_v16 = vmul.f32 %v3418_v44, %v2627_v2 }
 0xa32   :  { %v2477_v24 = vadd.f32 %v2476_v16, %v2475_v5 }
 0xa34   :  { %3419 = vtanh.f32 %v2477_v24 }
 0xa3e   :  { %v3420_v45 = vpop.eup %3419 }
 0xa3f   :  { %v2481_v35 = vmul.f32 %v3420_v45, %v2479_v33 }
 0xa41   :  { %2482 = vst [vmem:[#allocation3 + $0x7] sm:$0x1] %v2481_v35 }
 0xa48   :  { %v2483_v62 = vld [vmem:[#allocation3] sm:$0xff] }
 0xa49   :  { %2731 = vmatmul.mubr.f32.vlgmr.msra.gmra.mrb[18].mxu1 %v2483_v62 }
 0xb1c   :  { %v2573_v10 = vpop.f32.mrb[18].mxu1 }
 0xb1d   :  { %v2574_v54 = vadd.f32 %v2628_v7, %v2573_v10  ;;  %v2732_v18 = vpop.f32.mrb[19].mxu1 }
 0xb1f   :  { %v2578_v21 = vadd.f32 %v2577_v27, %v2574_v54 }
 0xb21   :  { %v2579_v32 = vmul.f32 2.0, %v2578_v21 }
 0xb23   :  { %2580 = vmax.xlane.f32.xlu0 %v2579_v32 }
 0xbb0   :  { %v2581_v59 = vpop.xlane.xlu0 %2580 }
 0xbb1   :  { %v2582_v6 = vsub.f32 %v2579_v32, %v2581_v59 }
 0xbb3   :  { %v2583_v63 = vmul.f32 1.442695, %v2582_v6 }
 0xbb5   :  { %3421 = vpow2.f32 %v2583_v63 }
 0xbbf   :  { %v3422_v4 = vpop.eup %3421 }
 0xbc0   :  { %2585 = vadd.xlane.f32.xlu1 %v3422_v4 }
 0xc4d   :  { %v2586_v23 = vpop.xlane.xlu1 %2585 }
 0xc4e   :  { %3423 = vrcp.f32 %v2586_v23 }
 0xc58   :  { %v3424_v34 = vpop.eup %3423 }
 0xc59   :  { %v2588_v37 = vmul.f32 %v3424_v34, %v2586_v23 }
 0xc5b   :  { %v2589_v49 = vsub.f32 2.0, %v2588_v37 }
 0xc5d   :  { %v2590_v58 = vmul.f32 %v3424_v34, %v2589_v49 }
 0xc5f   :  { %v2591_v61 = vmul.f32 %v3422_v4, %v2590_v58 }
 0xc61   :  { %2592 = vst [vmem:[#allocation12] sm:$0xff] %v2591_v61 }
 0xc62   :  { %3524 = shalt.err (!%p3521_p8)
}
 0xc63   :  { %s3525_s19 = scalar_lea.hbm %s4178_s8, 128 }
 0xc64   :  { %p3526_p9 = scmp.ne.s32.totalorder %s4178_s8, %s3525_s19  ;;  %p3529_p10 = scmp.lt.u32.totalorder %s3525_s19, %s4178_s8 }
 0xc66   :  { %p3531_p11 = pnand %p3529_p10, %p3526_p9 }
 0xc68   :  { %3534 = shalt.err (!%p3531_p11)
}
 0xc69   :  { %2602 = dma.vmem_to_hbm [thread:$0]  %s2600_s14, 128, %s4178_s8, [#allocation6]  }
 0xc6a   :  { %3541 = dma.done.wait [#allocation6], 128  }
 0xc6b   :  { %3542 = vsyncadd [#allocation6], 4294967168 }
 0xc6c   :  { %2606 = vsyncpa [#allocation5], 1 }
 0xc6d   :  { %2607 = vsyncpa [#allocation8], 1 }
 0xc6e   :  { %2608 = vsyncpa [#allocation11], 1 }
 0xc6f   :  { %2609 = vsyncpa [#allocation6], 1 }

</bundles_post_ra>
